<compile_context>
chip_gen: v7x
topology: tpu7x:2x2x1
jax: 0.10.0
libtpu: 0.0.40
codegen_flags: <defaults>
</compile_context>

<pallas_src>
import jax
import jax.numpy as jnp
from jax import lax
from jax.experimental import pallas as pl
from jax.experimental.pallas import tpu as pltpu


# ----------------------------------------------------------------------------------
# Stage 1: attention + context + gate-major GRU input pre-activations (parallel grid)
# ----------------------------------------------------------------------------------
def _attn_prepass_kernel(v_ref, wpv_ref, vq_ref, mask_ref, wp_t_ref, vrow_ref,
                         wihv_ref, wihc_ref, bih_ref,
                         gi_ref,
                         wpq_scr, a_scr, c_scr):
    Tq, B, D = vq_ref.shape
    L = v_ref.shape[1]
    H = wp_t_ref.shape[1]

    # Query-side projection Wp(v_i) for the whole tile in one MXU matmul.
    wpq_scr[...] = jnp.dot(vq_ref[...], wp_t_ref[...],
                           preferred_element_type=jnp.float32).astype(wpq_scr.dtype)

    # q-invariant loads hoisted out of the query loop.
    wpv = wpv_ref[...]                                             # (B, L, H) keys (hoisted)
    m = mask_ref[...]                                              # (B, L)
    vrow_b = vrow_ref[...].reshape(1, 1, H).astype(jnp.float32)    # hoisted broadcast

    @pl.loop(0, Tq)
    def _(q):
        # Scores: tanh (EUP) then VPU multiply + lane reduce over H (avoids the
        # degenerate (H,1) MXU matvec).  In bf16 mode the tanh runs in bf16.
        x = jnp.tanh(wpv + wpq_scr[q][:, None, :])                 # (B, L, H)
        s = jnp.sum(x.astype(jnp.float32) * vrow_b, axis=-1)       # (B, L) f32

        # Masked softmax over the sequence axis (multiplicative masking, R-Net style).
        sm = s * m
        e = jnp.exp(sm - jnp.max(sm, axis=1, keepdims=True)) * m
        denom = jnp.sum(e, axis=1, keepdims=True) + 1e-6
        inv = pl.reciprocal(denom, approx=True)
        inv = inv * (2.0 - denom * inv)                            # one Newton step -> ~f32
        a_scr[q] = e * inv                                         # attention probs (B, L)

    # Context vectors for the whole tile on the MXU: one (Tq,L)x(L,D) matmul per batch
    # row.  The static batch loop keeps the q-major layout (no in-kernel transpose of a
    # batched dot_general output) and each matmul is well shaped for the MXU.
    for b in range(B):
        c_scr[:, b, :] = jnp.dot(a_scr[:, b, :].astype(c_scr.dtype), v_ref[b],
                                 preferred_element_type=jnp.float32).astype(c_scr.dtype)

    # GRU input-gate pre-activations, gate-major (Tq, 3, B, H): per-gate MXU matmuls so
    # stage 2 selects r/z/n by a leading-axis index instead of lane slicing.  Stage 1 is
    # EUP(tanh)-bound, so the slightly lower MXU lane utilisation here is hidden.
    vq = vq_ref[...]
    c = c_scr[...]
    for g in range(3):
        gi_g = (jnp.dot(vq, wihv_ref[g], preferred_element_type=jnp.float32)
                + jnp.dot(c, wihc_ref[g], preferred_element_type=jnp.float32)
                + bih_ref[g])                                      # (Tq, B, H) f32
        gi_ref[:, g] = gi_g.astype(gi_ref.dtype)


# ----------------------------------------------------------------------------------
# Stage 2: sequential GRUCell recurrence, chunked over L (hidden state in scratch)
# ----------------------------------------------------------------------------------
def _gru_recurrence_kernel(gi_ref, whh_ref, bhh_ref, hs_ref, h_scr):
    Lc = gi_ref.shape[0]
    B, H = hs_ref.shape[1], hs_ref.shape[2]

    @pl.when(pl.program_id(0) == 0)
    def _():
        h_scr[...] = jnp.zeros_like(h_scr)

    # Hoisted, timestep-invariant weight loads / bias broadcasts (off the serial path).
    whh_r = whh_ref[0]
    whh_z = whh_ref[1]
    whh_n = whh_ref[2]
    bhh_r = jnp.broadcast_to(bhh_ref[0], (B, H))
    bhh_z = jnp.broadcast_to(bhh_ref[1], (B, H))
    bhh_n = jnp.broadcast_to(bhh_ref[2], (B, H))

    def body(t, h):
        gi = gi_ref[t].astype(jnp.float32)          # (3, B, H); gate select = leading index
        gh_r = jnp.dot(h, whh_r, preferred_element_type=jnp.float32) + bhh_r
        gh_z = jnp.dot(h, whh_z, preferred_element_type=jnp.float32) + bhh_z
        gh_n = jnp.dot(h, whh_n, preferred_element_type=jnp.float32) + bhh_n
        r = jax.nn.sigmoid(gi[0] + gh_r)
        z = jax.nn.sigmoid(gi[1] + gh_z)
        n = jnp.tanh(gi[2] + r * gh_n)
        h_new = (1.0 - z) * n + z * h
        hs_ref[t] = h_new.astype(hs_ref.dtype)      # resident output chunk
        return h_new

    # unroll=2: gives the LLO scheduler visibility to overlap the next step's gi row
    # load / EUP work with the current step's tiny MXU matmuls on the serial chain.
    h_scr[...] = lax.fori_loop(0, Lc, body, h_scr[...], unroll=2)


# ----------------------------------------------------------------------------------
# Helpers
# ----------------------------------------------------------------------------------
def _pick_tile(L, target, prefer_even_tiles):
    """Largest tile size <= target that divides L; optionally prefer an even tile count
    (keeps both v7x TensorCores busy on the 'parallel' axis).  NOTE: a prime L degrades
    to tile=1 - pad L upstream in production."""
    target = max(1, min(L, int(target)))
    divs = [t for t in range(1, target + 1) if L % t == 0]
    if prefer_even_tiles:
        even = [t for t in divs if (L // t) % 2 == 0]
        if even:
            return max(even)
    return max(divs)


def _vmem_limit_bytes():
    """Generation-aware scoped-VMEM limit: ~3/4 of physical VMEM, capped at 100 MiB
    (=> ~96 MiB on v5e/v6e's 128 MiB, ~48 MiB on v7x's 64 MiB / unknown chips)."""
    cap = None
    try:
        cap = int(pltpu.get_tpu_info().vmem_capacity_bytes)
    except Exception:
        cap = None
    if not cap or cap <= 0:
        cap = 64 * 1024 * 1024
    return max(32 * 1024 * 1024, min(cap * 3 // 4, 100 * 1024 * 1024))


# ----------------------------------------------------------------------------------
# Wrapper
# ----------------------------------------------------------------------------------
def self_matcher(v, mask, params, *, tq=None, lc=None, compute_dtype=jnp.bfloat16):
    B, L, D = v.shape
    H = params["Wp"].shape[0]
    f32 = jnp.float32
    cdt = jnp.dtype(compute_dtype)       # MXU operand / large-intermediate dtype

    tq = _pick_tile(L, 128 if tq is None else tq, prefer_even_tiles=True)
    nq = L // tq
    lc = _pick_tile(L, 64 if lc is None else lc, prefer_even_tiles=False)

    mask_f = mask.astype(f32)
    v_c = v.astype(f32).astype(cdt)
    vq_c = jnp.transpose(v_c, (1, 0, 2))                    # (L, B, D) time-major queries

    wp_t = params["Wp"].T.astype(cdt)                       # (D, H) applied to v_i (queries)
    wp2_t = params["Wp_"].T.astype(cdt)                     # (D, H) applied to full v (keys)
    vrow = params["V"].reshape(1, H).astype(f32)

    # Hoisted key-side projection Wp_(v): computed ONCE here (plain XLA matmul) and fed
    # to stage 1 as a resident input (no per-tile recompute).
    wpv = jnp.einsum("bld,dh->blh", v_c, wp2_t,
                     preferred_element_type=f32).astype(cdt)          # (B, L, H)

    # Per-gate weight splits (gate-major everywhere downstream).
    w_ih = params["w_ih"].reshape(3, H, 2 * D)
    wihv = jnp.transpose(w_ih[:, :, :D], (0, 2, 1)).astype(cdt)       # (3, D, H) acts on v_t
    wihc = jnp.transpose(w_ih[:, :, D:], (0, 2, 1)).astype(cdt)       # (3, D, H) acts on c_t
    bih = params["b_ih"].reshape(3, 1, H).astype(f32)
    whh_t = jnp.transpose(params["w_hh"].reshape(3, H, H), (0, 2, 1)).astype(f32)  # (3,H,H)
    bhh = params["b_hh"].reshape(3, 1, H).astype(f32)

    gi_dtype = cdt                       # bf16 gi halves the stage-1 <-> stage-2 HBM traffic
    vmem_limit = _vmem_limit_bytes()

    # ---------------- Stage 1: attention pre-pass (parallel over query tiles) --------
    def _run_stage1(single_buffer):
        def const_spec(shape):
            nd = len(shape)
            kwargs = {}
            if single_buffer:
                # Resident, never-changing block: no point double-buffering it.
                kwargs["pipeline_mode"] = pl.Buffered(1)
            return pl.BlockSpec(shape, lambda q, _n=nd: (0,) * _n, **kwargs)

        return pl.pallas_call(
            _attn_prepass_kernel,
            out_shape=jax.ShapeDtypeStruct((L, 3, B, H), gi_dtype),
            grid_spec=pltpu.PrefetchScalarGridSpec(
                num_scalar_prefetch=0,
                grid=(nq,),
                in_specs=[
                    const_spec((B, L, D)),                              # v (context values)
                    const_spec((B, L, H)),                              # Wp_(v) keys (hoisted)
                    pl.BlockSpec((tq, B, D), lambda q: (q, 0, 0)),      # v queries (time-major)
                    const_spec((B, L)),                                 # mask
                    const_spec((D, H)),                                 # Wp^T (queries)
                    const_spec((1, H)),                                 # V row
                    const_spec((3, D, H)),                              # W_ih^T, v half, per gate
                    const_spec((3, D, H)),                              # W_ih^T, c half, per gate
                    const_spec((3, 1, H)),                              # b_ih per gate
                ],
                out_specs=pl.BlockSpec((tq, 3, B, H), lambda q: (q, 0, 0, 0)),
                scratch_shapes=[
                    pltpu.VMEM((tq, B, H), cdt),           # Wp(v_i) for the tile
                    pltpu.VMEM((tq, B, L), jnp.float32),   # attention probabilities
                    pltpu.VMEM((tq, B, D), cdt),           # context vectors
                ],
            ),
            compiler_params=pltpu.CompilerParams(
                dimension_semantics=("parallel",),
                vmem_limit_bytes=vmem_limit),
        )(v_c, wpv, vq_c, mask_f, wp_t, vrow, wihv, wihc, bih)

    try:
        gi = _run_stage1(single_buffer=True)
    except Exception:
        # pipeline_mode=pl.Buffered may be unavailable on this jax version; fall back to
        # default double-buffering (correctness identical, slightly more VMEM).
        gi = _run_stage1(single_buffer=False)

    # ---------------- Stage 2: sequential GRU recurrence, chunked over L -------------
    hs_t = pl.pallas_call(
        _gru_recurrence_kernel,
        out_shape=jax.ShapeDtypeStruct((L, B, H), jnp.float32),
        grid_spec=pltpu.PrefetchScalarGridSpec(
            num_scalar_prefetch=0,
            grid=(L // lc,),
            in_specs=[
                pl.BlockSpec((lc, 3, B, H), lambda i: (i, 0, 0, 0)),    # gi chunk (streamed)
                pl.BlockSpec((3, H, H), lambda i: (0, 0, 0)),           # W_hh^T per gate
                pl.BlockSpec((3, 1, H), lambda i: (0, 0, 0)),           # b_hh per gate
            ],
            out_specs=pl.BlockSpec((lc, B, H), lambda i: (i, 0, 0)),
            scratch_shapes=[pltpu.VMEM((B, H), jnp.float32)],           # hidden state carry
        ),
        compiler_params=pltpu.CompilerParams(
            dimension_semantics=("arbitrary",),                         # sequential: h carries
            vmem_limit_bytes=vmem_limit),
    )(gi, whh_t, bhh)

    hs = jnp.transpose(hs_t, (1, 0, 2))                                 # (B, L, H)
    return hs, hs[:, -1, :]


# ----------------------------------------------------------------------------------
# Pure-JAX reference (replicates the PyTorch forward, eval mode)
# ----------------------------------------------------------------------------------
def reference(v, mask, params):
    B, L, D = v.shape
    H = params["Wp"].shape[0]
    h = jnp.zeros((B, H), jnp.float32)
    wpv = v @ params["Wp_"].T
    hs = []
    for i in range(L):
        vi = v[:, i, :]
        x = jnp.tanh(wpv + (vi @ params["Wp"].T)[:, None, :])
        s = (x @ params["V"].T)[:, :, 0]
        sm = s * mask
        e = jnp.exp(sm - jnp.max(sm, axis=1, keepdims=True)) * mask
        a = e / (jnp.sum(e, axis=1, keepdims=True) + 1e-6)
        c = jnp.sum(a[:, :, None] * v, axis=1)
        r = jnp.concatenate([vi, c], axis=1)
        gi = r @ params["w_ih"].T + params["b_ih"]
        gh = h @ params["w_hh"].T + params["b_hh"]
        rg = jax.nn.sigmoid(gi[:, :H] + gh[:, :H])
        zg = jax.nn.sigmoid(gi[:, H:2 * H] + gh[:, H:2 * H])
        ng = jnp.tanh(gi[:, 2 * H:] + rg * gh[:, 2 * H:])
        h = (1.0 - zg) * ng + zg * h
        hs.append(h)
    hs = jnp.stack(hs, axis=1)
    return hs, hs[:, -1, :]


if __name__ == "__main__":
    B, L, D, H = 2, 8, 32, 32   # batch, seq, in_size, hidden_size

    key = jax.random.PRNGKey(0)
    keys = jax.random.split(key, 8)
    params = {
        "Wp":   0.1 * jax.random.normal(keys[0], (H, D), jnp.float32),
        "Wp_":  0.1 * jax.random.normal(keys[1], (H, D), jnp.float32),
        "V":    0.1 * jax.random.normal(keys[2], (1, H), jnp.float32),
        "w_ih": 0.1 * jax.random.normal(keys[3], (3 * H, 2 * D), jnp.float32),
        "w_hh": 0.1 * jax.random.normal(keys[4], (3 * H, H), jnp.float32),
        "b_ih": 0.1 * jax.random.normal(keys[5], (3 * H,), jnp.float32),
        "b_hh": 0.1 * jax.random.normal(keys[6], (3 * H,), jnp.float32),
    }

    v = jax.random.normal(keys[7], (B, L, D), jnp.float32)
    mask = jnp.ones((B, L), jnp.float32).at[1, 5:].set(0.0)   # second seq has length 5

    hs_ref, h_ref = reference(v, mask, params)

    # Strict check: f32 compute path (matches the PyTorch forward semantics closely).
    hs32, h32 = self_matcher(v, mask, params, tq=4, lc=4, compute_dtype=jnp.float32)
    jax.block_until_ready((hs32, h32))
    assert jnp.allclose(hs32, hs_ref, atol=1e-4, rtol=1e-4), "hs mismatch (f32)"
    assert jnp.allclose(h32, h_ref, atol=1e-4, rtol=1e-4), "h mismatch (f32)"

    # Default production path: bf16 MXU operands / intermediates, f32 accumulation.
    hs16, h16 = self_matcher(v, mask, params, tq=4, lc=4)
    jax.block_until_ready((hs16, h16))
    assert jnp.allclose(hs16, hs_ref, atol=8e-2, rtol=8e-2), "hs mismatch (bf16)"
    assert jnp.allclose(h16, h_ref, atol=8e-2, rtol=8e-2), "h mismatch (bf16)"

    print("KERNEL_OK")
</pallas_src>

<mosaic_0001>
module attributes {stable_mosaic.version = 11 : i64} {
  func.func @_attn_prepass_kernel(%arg0: i32, %arg1: memref<2x8x32xf32, #tpu.memory_space<vmem>>, %arg2: memref<2x8x32xf32, #tpu.memory_space<vmem>>, %arg3: memref<4x2x32xf32, #tpu.memory_space<vmem>>, %arg4: memref<2x8xf32, #tpu.memory_space<vmem>>, %arg5: memref<32x32xf32, #tpu.memory_space<vmem>>, %arg6: memref<1x32xf32, #tpu.memory_space<vmem>>, %arg7: memref<3x32x32xf32, #tpu.memory_space<vmem>>, %arg8: memref<3x32x32xf32, #tpu.memory_space<vmem>>, %arg9: memref<3x1x32xf32, #tpu.memory_space<vmem>>, %arg10: memref<4x3x2x32xf32, #tpu.memory_space<vmem>>, %arg11: memref<4x2x32xf32, #tpu.memory_space<vmem>>, %arg12: memref<4x2x8xf32, #tpu.memory_space<vmem>>, %arg13: memref<4x2x32xf32, #tpu.memory_space<vmem>>) attributes {dimension_semantics = [#tpu.dimension_semantics<parallel>], iteration_bounds = array<i64: 2>, scalar_prefetch = 0 : i64, scratch_operands = 3 : i64, tpu.core_type = #tpu.core_type<tc>, window_params = [{pipeline_mode = #tpu.pipeline_mode<synchronous>, transform_indices = @transform_0, window_bounds = array<i64: 2, 8, 32>}, {pipeline_mode = #tpu.pipeline_mode<synchronous>, transform_indices = @transform_1, window_bounds = array<i64: 2, 8, 32>}, {transform_indices = @transform_2, window_bounds = array<i64: 4, 2, 32>}, {pipeline_mode = #tpu.pipeline_mode<synchronous>, transform_indices = @transform_3, window_bounds = array<i64: 2, 8>}, {pipeline_mode = #tpu.pipeline_mode<synchronous>, transform_indices = @transform_4, window_bounds = array<i64: 32, 32>}, {pipeline_mode = #tpu.pipeline_mode<synchronous>, transform_indices = @transform_5, window_bounds = array<i64: 1, 32>}, {pipeline_mode = #tpu.pipeline_mode<synchronous>, transform_indices = @transform_6, window_bounds = array<i64: 3, 32, 32>}, {pipeline_mode = #tpu.pipeline_mode<synchronous>, transform_indices = @transform_7, window_bounds = array<i64: 3, 32, 32>}, {pipeline_mode = #tpu.pipeline_mode<synchronous>, transform_indices = @transform_8, window_bounds = array<i64: 3, 1, 32>}, {transform_indices = @transform_9, window_bounds = array<i64: 4, 3, 2, 32>}]} {
    %c0 = arith.constant 0 : index
    %c0_0 = arith.constant 0 : index
    %c0_1 = arith.constant 0 : index
    %0 = vector.load %arg3[%c0, %c0_0, %c0_1] : memref<4x2x32xf32, #tpu.memory_space<vmem>>, vector<4x2x32xf32>
    %c0_2 = arith.constant 0 : index
    %c0_3 = arith.constant 0 : index
    %1 = vector.load %arg5[%c0_2, %c0_3] : memref<32x32xf32, #tpu.memory_space<vmem>>, vector<32x32xf32>
    %cst = arith.constant dense<0.000000e+00> : vector<4x2x32xf32>
    %2 = tpu.matmul %0, %1, %cst {dimension_numbers = #tpu.dot_dimension_numbers<[2], [0], [0, 1], [1], [0, 0, 0, 1, 1, 1], [], []>} : vector<4x2x32xf32>, vector<32x32xf32>, vector<4x2x32xf32> -> vector<4x2x32xf32>
    %c0_4 = arith.constant 0 : index
    %c0_5 = arith.constant 0 : index
    %c0_6 = arith.constant 0 : index
    %3 = vector.load %arg11[%c0_4, %c0_5, %c0_6] : memref<4x2x32xf32, #tpu.memory_space<vmem>>, vector<4x2x32xf32>
    tpu.vector_store %arg11[%c0_4, %c0_5, %c0_6], %2 {strides = array<i32>} : memref<4x2x32xf32, #tpu.memory_space<vmem>>, vector<4x2x32xf32>,
    %c0_7 = arith.constant 0 : index
    %c0_8 = arith.constant 0 : index
    %c0_9 = arith.constant 0 : index
    %4 = vector.load %arg2[%c0_7, %c0_8, %c0_9] : memref<2x8x32xf32, #tpu.memory_space<vmem>>, vector<2x8x32xf32>
    %c0_10 = arith.constant 0 : index
    %c0_11 = arith.constant 0 : index
    %5 = vector.load %arg4[%c0_10, %c0_11] : memref<2x8xf32, #tpu.memory_space<vmem>>, vector<2x8xf32>
    %c0_12 = arith.constant 0 : index
    %c0_13 = arith.constant 0 : index
    %6 = vector.load %arg6[%c0_12, %c0_13] : memref<1x32xf32, #tpu.memory_space<vmem>>, vector<1x32xf32>
    %7 = vector.shape_cast %6 : vector<1x32xf32> to vector<1x1x32xf32>
    %c0_i32 = arith.constant 0 : i32
    %c4_i32 = arith.constant 4 : i32
    %8 = arith.addi %c0_i32, %c4_i32 : i32
    %c1_i32 = arith.constant 1 : i32
    scf.for %arg14 = %c0_i32 to %8 step %c1_i32  : i32 {
      %c1_i32_84 = arith.constant 1 : i32
      %72 = arith.muli %arg14, %c1_i32_84 : i32
      %c0_i32_85 = arith.constant 0 : i32
      %73 = arith.addi %c0_i32_85, %72 : i32
      %74 = arith.index_cast %73 : i32 to index
      %c0_86 = arith.constant 0 : index
      %c0_87 = arith.constant 0 : index
      %75 = vector.load %arg11[%74, %c0_86, %c0_87] : memref<4x2x32xf32, #tpu.memory_space<vmem>>, vector<1x2x32xf32>
      %76 = vector.shape_cast %75 : vector<1x2x32xf32> to vector<2x32xf32>
      %77 = vector.shape_cast %76 : vector<2x32xf32> to vector<2x1x32xf32>
      %78 = vector.broadcast %77 : vector<2x1x32xf32> to vector<2x8x32xf32>
      %79 = arith.addf %4, %78 : vector<2x8x32xf32>
      %80 = math.tanh %79 : vector<2x8x32xf32>
      %81 = vector.broadcast %7 : vector<1x1x32xf32> to vector<2x8x32xf32>
      %82 = arith.mulf %80, %81 : vector<2x8x32xf32>
      %cst_88 = arith.constant dense<0.000000e+00> : vector<2x8xf32>
      %83 = vector.multi_reduction <add>, %82, %cst_88 [2] : vector<2x8x32xf32> to vector<2x8xf32>
      %84 = arith.mulf %83, %5 : vector<2x8xf32>
      %cst_89 = arith.constant dense<0xFF800000> : vector<2xf32>
      %85 = vector.multi_reduction <maximumf>, %84, %cst_89 [1] : vector<2x8xf32> to vector<2xf32>
      %86 = vector.shape_cast %85 : vector<2xf32> to vector<2x1xf32>
      %87 = vector.broadcast %86 : vector<2x1xf32> to vector<2x8xf32>
      %88 = arith.subf %84, %87 : vector<2x8xf32>
      %89 = math.exp %88 : vector<2x8xf32>
      %90 = arith.mulf %89, %5 : vector<2x8xf32>
      %cst_90 = arith.constant dense<0.000000e+00> : vector<2xf32>
      %91 = vector.multi_reduction <add>, %90, %cst_90 [1] : vector<2x8xf32> to vector<2xf32>
      %92 = vector.shape_cast %91 : vector<2xf32> to vector<2x1xf32>
      %cst_91 = arith.constant 9.99999997E-7 : f32
      %93 = vector.broadcast %cst_91 : f32 to vector<2x1xf32>
      %94 = arith.addf %92, %93 : vector<2x1xf32>
      %95 = tpu.reciprocal %94 {approx = true} : vector<2x1xf32> -> vector<2x1xf32>
      %96 = arith.mulf %94, %95 : vector<2x1xf32>
      %cst_92 = arith.constant 2.000000e+00 : f32
      %97 = vector.broadcast %cst_92 : f32 to vector<2x1xf32>
      %98 = arith.subf %97, %96 : vector<2x1xf32>
      %99 = arith.mulf %95, %98 : vector<2x1xf32>
      %100 = vector.broadcast %99 : vector<2x1xf32> to vector<2x8xf32>
      %101 = arith.mulf %90, %100 : vector<2x8xf32>
      %102 = arith.index_cast %73 : i32 to index
      %c0_93 = arith.constant 0 : index
      %c0_94 = arith.constant 0 : index
      %103 = vector.load %arg12[%102, %c0_93, %c0_94] : memref<4x2x8xf32, #tpu.memory_space<vmem>>, vector<1x2x8xf32>
      %104 = vector.shape_cast %103 : vector<1x2x8xf32> to vector<2x8xf32>
      %105 = vector.shape_cast %101 : vector<2x8xf32> to vector<1x2x8xf32>
      tpu.vector_store %arg12[%102, %c0_93, %c0_94], %105 {strides = array<i32>} : memref<4x2x8xf32, #tpu.memory_space<vmem>>, vector<1x2x8xf32>,
    }
    %c4_i32_14 = arith.constant 4 : i32
    %c0_15 = arith.constant 0 : index
    %c0_16 = arith.constant 0 : index
    %c0_17 = arith.constant 0 : index
    %9 = vector.load %arg12[%c0_15, %c0_16, %c0_17] : memref<4x2x8xf32, #tpu.memory_space<vmem>>, vector<4x1x8xf32>
    %10 = vector.shape_cast %9 : vector<4x1x8xf32> to vector<4x8xf32>
    %c0_18 = arith.constant 0 : index
    %c0_19 = arith.constant 0 : index
    %c0_20 = arith.constant 0 : index
    %11 = vector.load %arg1[%c0_18, %c0_19, %c0_20] : memref<2x8x32xf32, #tpu.memory_space<vmem>>, vector<1x8x32xf32>
    %12 = vector.shape_cast %11 : vector<1x8x32xf32> to vector<8x32xf32>
    %cst_21 = arith.constant dense<0.000000e+00> : vector<4x32xf32>
    %13 = tpu.matmul %10, %12, %cst_21 {dimension_numbers = #tpu.dot_dimension_numbers<[1], [0], [0], [1], [0, 0, 1, 1], [], []>} : vector<4x8xf32>, vector<8x32xf32>, vector<4x32xf32> -> vector<4x32xf32>
    %c0_22 = arith.constant 0 : index
    %c0_23 = arith.constant 0 : index
    %c0_24 = arith.constant 0 : index
    %14 = vector.load %arg13[%c0_22, %c0_23, %c0_24] : memref<4x2x32xf32, #tpu.memory_space<vmem>>, vector<4x1x32xf32>
    %15 = vector.shape_cast %14 : vector<4x1x32xf32> to vector<4x32xf32>
    %16 = vector.shape_cast %13 : vector<4x32xf32> to vector<4x1x32xf32>
    tpu.vector_store %arg13[%c0_22, %c0_23, %c0_24], %16 {strides = array<i32>} : memref<4x2x32xf32, #tpu.memory_space<vmem>>, vector<4x1x32xf32>,
    %c0_25 = arith.constant 0 : index
    %c1 = arith.constant 1 : index
    %c0_26 = arith.constant 0 : index
    %17 = vector.load %arg12[%c0_25, %c1, %c0_26] : memref<4x2x8xf32, #tpu.memory_space<vmem>>, vector<4x1x8xf32>
    %18 = vector.shape_cast %17 : vector<4x1x8xf32> to vector<4x8xf32>
    %c1_27 = arith.constant 1 : index
    %c0_28 = arith.constant 0 : index
    %c0_29 = arith.constant 0 : index
    %19 = vector.load %arg1[%c1_27, %c0_28, %c0_29] : memref<2x8x32xf32, #tpu.memory_space<vmem>>, vector<1x8x32xf32>
    %20 = vector.shape_cast %19 : vector<1x8x32xf32> to vector<8x32xf32>
    %cst_30 = arith.constant dense<0.000000e+00> : vector<4x32xf32>
    %21 = tpu.matmul %18, %20, %cst_30 {dimension_numbers = #tpu.dot_dimension_numbers<[1], [0], [0], [1], [0, 0, 1, 1], [], []>} : vector<4x8xf32>, vector<8x32xf32>, vector<4x32xf32> -> vector<4x32xf32>
    %c0_31 = arith.constant 0 : index
    %c1_32 = arith.constant 1 : index
    %c0_33 = arith.constant 0 : index
    %22 = vector.load %arg13[%c0_31, %c1_32, %c0_33] : memref<4x2x32xf32, #tpu.memory_space<vmem>>, vector<4x1x32xf32>
    %23 = vector.shape_cast %22 : vector<4x1x32xf32> to vector<4x32xf32>
    %24 = vector.shape_cast %21 : vector<4x32xf32> to vector<4x1x32xf32>
    tpu.vector_store %arg13[%c0_31, %c1_32, %c0_33], %24 {strides = array<i32>} : memref<4x2x32xf32, #tpu.memory_space<vmem>>, vector<4x1x32xf32>,
    %c0_34 = arith.constant 0 : index
    %c0_35 = arith.constant 0 : index
    %c0_36 = arith.constant 0 : index
    %25 = vector.load %arg3[%c0_34, %c0_35, %c0_36] : memref<4x2x32xf32, #tpu.memory_space<vmem>>, vector<4x2x32xf32>
    %c0_37 = arith.constant 0 : index
    %c0_38 = arith.constant 0 : index
    %c0_39 = arith.constant 0 : index
    %26 = vector.load %arg13[%c0_37, %c0_38, %c0_39] : memref<4x2x32xf32, #tpu.memory_space<vmem>>, vector<4x2x32xf32>
    %c0_40 = arith.constant 0 : index
    %c0_41 = arith.constant 0 : index
    %c0_42 = arith.constant 0 : index
    %27 = vector.load %arg7[%c0_40, %c0_41, %c0_42] : memref<3x32x32xf32, #tpu.memory_space<vmem>>, vector<1x32x32xf32>
    %28 = vector.shape_cast %27 : vector<1x32x32xf32> to vector<32x32xf32>
    %cst_43 = arith.constant dense<0.000000e+00> : vector<4x2x32xf32>
    %29 = tpu.matmul %25, %28, %cst_43 {dimension_numbers = #tpu.dot_dimension_numbers<[2], [0], [0, 1], [1], [0, 0, 0, 1, 1, 1], [], []>} : vector<4x2x32xf32>, vector<32x32xf32>, vector<4x2x32xf32> -> vector<4x2x32xf32>
    %c0_44 = arith.constant 0 : index
    %c0_45 = arith.constant 0 : index
    %c0_46 = arith.constant 0 : index
    %30 = vector.load %arg8[%c0_44, %c0_45, %c0_46] : memref<3x32x32xf32, #tpu.memory_space<vmem>>, vector<1x32x32xf32>
    %31 = vector.shape_cast %30 : vector<1x32x32xf32> to vector<32x32xf32>
    %cst_47 = arith.constant dense<0.000000e+00> : vector<4x2x32xf32>
    %32 = tpu.matmul %26, %31, %cst_47 {dimension_numbers = #tpu.dot_dimension_numbers<[2], [0], [0, 1], [1], [0, 0, 0, 1, 1, 1], [], []>} : vector<4x2x32xf32>, vector<32x32xf32>, vector<4x2x32xf32> -> vector<4x2x32xf32>
    %33 = arith.addf %29, %32 : vector<4x2x32xf32>
    %c0_48 = arith.constant 0 : index
    %c0_49 = arith.constant 0 : index
    %c0_50 = arith.constant 0 : index
    %34 = vector.load %arg9[%c0_48, %c0_49, %c0_50] : memref<3x1x32xf32, #tpu.memory_space<vmem>>, vector<1x1x32xf32>
    %35 = vector.shape_cast %34 : vector<1x1x32xf32> to vector<1x32xf32>
    %36 = vector.shape_cast %35 : vector<1x32xf32> to vector<1x1x32xf32>
    %37 = vector.broadcast %36 : vector<1x1x32xf32> to vector<4x2x32xf32>
    %38 = arith.addf %33, %37 : vector<4x2x32xf32>
    %c0_51 = arith.constant 0 : index
    %c0_52 = arith.constant 0 : index
    %c0_53 = arith.constant 0 : index
    %c0_54 = arith.constant 0 : index
    %39 = vector.load %arg10[%c0_51, %c0_52, %c0_53, %c0_54] : memref<4x3x2x32xf32, #tpu.memory_space<vmem>>, vector<4x1x2x32xf32>
    %40 = vector.shape_cast %39 : vector<4x1x2x32xf32> to vector<4x2x32xf32>
    %41 = vector.shape_cast %38 : vector<4x2x32xf32> to vector<4x1x2x32xf32>
    tpu.vector_store %arg10[%c0_51, %c0_52, %c0_53, %c0_54], %41 {strides = array<i32>} : memref<4x3x2x32xf32, #tpu.memory_space<vmem>>, vector<4x1x2x32xf32>,
    %c1_55 = arith.constant 1 : index
    %c0_56 = arith.constant 0 : index
    %c0_57 = arith.constant 0 : index
    %42 = vector.load %arg7[%c1_55, %c0_56, %c0_57] : memref<3x32x32xf32, #tpu.memory_space<vmem>>, vector<1x32x32xf32>
    %43 = vector.shape_cast %42 : vector<1x32x32xf32> to vector<32x32xf32>
    %cst_58 = arith.constant dense<0.000000e+00> : vector<4x2x32xf32>
    %44 = tpu.matmul %25, %43, %cst_58 {dimension_numbers = #tpu.dot_dimension_numbers<[2], [0], [0, 1], [1], [0, 0, 0, 1, 1, 1], [], []>} : vector<4x2x32xf32>, vector<32x32xf32>, vector<4x2x32xf32> -> vector<4x2x32xf32>
    %c1_59 = arith.constant 1 : index
    %c0_60 = arith.constant 0 : index
    %c0_61 = arith.constant 0 : index
    %45 = vector.load %arg8[%c1_59, %c0_60, %c0_61] : memref<3x32x32xf32, #tpu.memory_space<vmem>>, vector<1x32x32xf32>
    %46 = vector.shape_cast %45 : vector<1x32x32xf32> to vector<32x32xf32>
    %cst_62 = arith.constant dense<0.000000e+00> : vector<4x2x32xf32>
    %47 = tpu.matmul %26, %46, %cst_62 {dimension_numbers = #tpu.dot_dimension_numbers<[2], [0], [0, 1], [1], [0, 0, 0, 1, 1, 1], [], []>} : vector<4x2x32xf32>, vector<32x32xf32>, vector<4x2x32xf32> -> vector<4x2x32xf32>
    %48 = arith.addf %44, %47 : vector<4x2x32xf32>
    %c1_63 = arith.constant 1 : index
    %c0_64 = arith.constant 0 : index
    %c0_65 = arith.constant 0 : index
    %49 = vector.load %arg9[%c1_63, %c0_64, %c0_65] : memref<3x1x32xf32, #tpu.memory_space<vmem>>, vector<1x1x32xf32>
    %50 = vector.shape_cast %49 : vector<1x1x32xf32> to vector<1x32xf32>
    %51 = vector.shape_cast %50 : vector<1x32xf32> to vector<1x1x32xf32>
    %52 = vector.broadcast %51 : vector<1x1x32xf32> to vector<4x2x32xf32>
    %53 = arith.addf %48, %52 : vector<4x2x32xf32>
    %c0_66 = arith.constant 0 : index
    %c1_67 = arith.constant 1 : index
    %c0_68 = arith.constant 0 : index
    %c0_69 = arith.constant 0 : index
    %54 = vector.load %arg10[%c0_66, %c1_67, %c0_68, %c0_69] : memref<4x3x2x32xf32, #tpu.memory_space<vmem>>, vector<4x1x2x32xf32>
    %55 = vector.shape_cast %54 : vector<4x1x2x32xf32> to vector<4x2x32xf32>
    %56 = vector.shape_cast %53 : vector<4x2x32xf32> to vector<4x1x2x32xf32>
    tpu.vector_store %arg10[%c0_66, %c1_67, %c0_68, %c0_69], %56 {strides = array<i32>} : memref<4x3x2x32xf32, #tpu.memory_space<vmem>>, vector<4x1x2x32xf32>,
    %c2 = arith.constant 2 : index
    %c0_70 = arith.constant 0 : index
    %c0_71 = arith.constant 0 : index
    %57 = vector.load %arg7[%c2, %c0_70, %c0_71] : memref<3x32x32xf32, #tpu.memory_space<vmem>>, vector<1x32x32xf32>
    %58 = vector.shape_cast %57 : vector<1x32x32xf32> to vector<32x32xf32>
    %cst_72 = arith.constant dense<0.000000e+00> : vector<4x2x32xf32>
    %59 = tpu.matmul %25, %58, %cst_72 {dimension_numbers = #tpu.dot_dimension_numbers<[2], [0], [0, 1], [1], [0, 0, 0, 1, 1, 1], [], []>} : vector<4x2x32xf32>, vector<32x32xf32>, vector<4x2x32xf32> -> vector<4x2x32xf32>
    %c2_73 = arith.constant 2 : index
    %c0_74 = arith.constant 0 : index
    %c0_75 = arith.constant 0 : index
    %60 = vector.load %arg8[%c2_73, %c0_74, %c0_75] : memref<3x32x32xf32, #tpu.memory_space<vmem>>, vector<1x32x32xf32>
    %61 = vector.shape_cast %60 : vector<1x32x32xf32> to vector<32x32xf32>
    %cst_76 = arith.constant dense<0.000000e+00> : vector<4x2x32xf32>
    %62 = tpu.matmul %26, %61, %cst_76 {dimension_numbers = #tpu.dot_dimension_numbers<[2], [0], [0, 1], [1], [0, 0, 0, 1, 1, 1], [], []>} : vector<4x2x32xf32>, vector<32x32xf32>, vector<4x2x32xf32> -> vector<4x2x32xf32>
    %63 = arith.addf %59, %62 : vector<4x2x32xf32>
    %c2_77 = arith.constant 2 : index
    %c0_78 = arith.constant 0 : index
    %c0_79 = arith.constant 0 : index
    %64 = vector.load %arg9[%c2_77, %c0_78, %c0_79] : memref<3x1x32xf32, #tpu.memory_space<vmem>>, vector<1x1x32xf32>
    %65 = vector.shape_cast %64 : vector<1x1x32xf32> to vector<1x32xf32>
    %66 = vector.shape_cast %65 : vector<1x32xf32> to vector<1x1x32xf32>
    %67 = vector.broadcast %66 : vector<1x1x32xf32> to vector<4x2x32xf32>
    %68 = arith.addf %63, %67 : vector<4x2x32xf32>
    %c0_80 = arith.constant 0 : index
    %c2_81 = arith.constant 2 : index
    %c0_82 = arith.constant 0 : index
    %c0_83 = arith.constant 0 : index
    %69 = vector.load %arg10[%c0_80, %c2_81, %c0_82, %c0_83] : memref<4x3x2x32xf32, #tpu.memory_space<vmem>>, vector<4x1x2x32xf32>
    %70 = vector.shape_cast %69 : vector<4x1x2x32xf32> to vector<4x2x32xf32>
    %71 = vector.shape_cast %68 : vector<4x2x32xf32> to vector<4x1x2x32xf32>
    tpu.vector_store %arg10[%c0_80, %c2_81, %c0_82, %c0_83], %71 {strides = array<i32>} : memref<4x3x2x32xf32, #tpu.memory_space<vmem>>, vector<4x1x2x32xf32>,
    return
  }
  func.func @transform_0(%arg0: i32) -> (i32, i32, i32) {
    %c0_i32 = arith.constant 0 : i32
    %c0_i32_0 = arith.constant 0 : i32
    %c0_i32_1 = arith.constant 0 : i32
    %c0_i32_2 = arith.constant 0 : i32
    return %c0_i32, %c0_i32_0, %c0_i32_1 : i32, i32, i32
  }
  func.func @transform_1(%arg0: i32) -> (i32, i32, i32) {
    %c0_i32 = arith.constant 0 : i32
    %c0_i32_0 = arith.constant 0 : i32
    %c0_i32_1 = arith.constant 0 : i32
    %c0_i32_2 = arith.constant 0 : i32
    return %c0_i32, %c0_i32_0, %c0_i32_1 : i32, i32, i32
  }
  func.func @transform_2(%arg0: i32) -> (i32, i32, i32) {
    %c0_i32 = arith.constant 0 : i32
    %c0_i32_0 = arith.constant 0 : i32
    %c0_i32_1 = arith.constant 0 : i32
    return %arg0, %c0_i32, %c0_i32_0 : i32, i32, i32
  }
  func.func @transform_3(%arg0: i32) -> (i32, i32) {
    %c0_i32 = arith.constant 0 : i32
    %c0_i32_0 = arith.constant 0 : i32
    %c0_i32_1 = arith.constant 0 : i32
    return %c0_i32, %c0_i32_0 : i32, i32
  }
  func.func @transform_4(%arg0: i32) -> (i32, i32) {
    %c0_i32 = arith.constant 0 : i32
    %c0_i32_0 = arith.constant 0 : i32
    %c0_i32_1 = arith.constant 0 : i32
    return %c0_i32, %c0_i32_0 : i32, i32
  }
  func.func @transform_5(%arg0: i32) -> (i32, i32) {
    %c0_i32 = arith.constant 0 : i32
    %c0_i32_0 = arith.constant 0 : i32
    %c0_i32_1 = arith.constant 0 : i32
    return %c0_i32, %c0_i32_0 : i32, i32
  }
  func.func @transform_6(%arg0: i32) -> (i32, i32, i32) {
    %c0_i32 = arith.constant 0 : i32
    %c0_i32_0 = arith.constant 0 : i32
    %c0_i32_1 = arith.constant 0 : i32
    %c0_i32_2 = arith.constant 0 : i32
    return %c0_i32, %c0_i32_0, %c0_i32_1 : i32, i32, i32
  }
  func.func @transform_7(%arg0: i32) -> (i32, i32, i32) {
    %c0_i32 = arith.constant 0 : i32
    %c0_i32_0 = arith.constant 0 : i32
    %c0_i32_1 = arith.constant 0 : i32
    %c0_i32_2 = arith.constant 0 : i32
    return %c0_i32, %c0_i32_0, %c0_i32_1 : i32, i32, i32
  }
  func.func @transform_8(%arg0: i32) -> (i32, i32, i32) {
    %c0_i32 = arith.constant 0 : i32
    %c0_i32_0 = arith.constant 0 : i32
    %c0_i32_1 = arith.constant 0 : i32
    %c0_i32_2 = arith.constant 0 : i32
    return %c0_i32, %c0_i32_0, %c0_i32_1 : i32, i32, i32
  }
  func.func @transform_9(%arg0: i32) -> (i32, i32, i32, i32) {
    %c0_i32 = arith.constant 0 : i32
    %c0_i32_0 = arith.constant 0 : i32
    %c0_i32_1 = arith.constant 0 : i32
    %c0_i32_2 = arith.constant 0 : i32
    return %arg0, %c0_i32, %c0_i32_0, %c0_i32_1 : i32, i32, i32, i32
  }
}

module attributes {stable_mosaic.version = 11 : i64} {
  func.func @_attn_prepass_kernel(%arg0: i32, %arg1: memref<2x8x32xf32, #tpu.memory_space<vmem>>, %arg2: memref<2x8x32xf32, #tpu.memory_space<vmem>>, %arg3: memref<4x2x32xf32, #tpu.memory_space<vmem>>, %arg4: memref<2x8xf32, #tpu.memory_space<vmem>>, %arg5: memref<32x32xf32, #tpu.memory_space<vmem>>, %arg6: memref<1x32xf32, #tpu.memory_space<vmem>>, %arg7: memref<3x32x32xf32, #tpu.memory_space<vmem>>, %arg8: memref<3x32x32xf32, #tpu.memory_space<vmem>>, %arg9: memref<3x1x32xf32, #tpu.memory_space<vmem>>, %arg10: memref<4x3x2x32xf32, #tpu.memory_space<vmem>>, %arg11: memref<4x2x32xf32, #tpu.memory_space<vmem>>, %arg12: memref<4x2x8xf32, #tpu.memory_space<vmem>>, %arg13: memref<4x2x32xf32, #tpu.memory_space<vmem>>) attributes {dimension_semantics = [#tpu.dimension_semantics<parallel>], iteration_bounds = array<i64: 2>, scalar_prefetch = 0 : i64, scratch_operands = 3 : i64, tpu.core_type = #tpu.core_type<tc>, window_params = [{pipeline_mode = #tpu.pipeline_mode<synchronous>, transform_indices = @transform_0, window_bounds = array<i64: 2, 8, 32>}, {pipeline_mode = #tpu.pipeline_mode<synchronous>, transform_indices = @transform_1, window_bounds = array<i64: 2, 8, 32>}, {transform_indices = @transform_2, window_bounds = array<i64: 4, 2, 32>}, {pipeline_mode = #tpu.pipeline_mode<synchronous>, transform_indices = @transform_3, window_bounds = array<i64: 2, 8>}, {pipeline_mode = #tpu.pipeline_mode<synchronous>, transform_indices = @transform_4, window_bounds = array<i64: 32, 32>}, {pipeline_mode = #tpu.pipeline_mode<synchronous>, transform_indices = @transform_5, window_bounds = array<i64: 1, 32>}, {pipeline_mode = #tpu.pipeline_mode<synchronous>, transform_indices = @transform_6, window_bounds = array<i64: 3, 32, 32>}, {pipeline_mode = #tpu.pipeline_mode<synchronous>, transform_indices = @transform_7, window_bounds = array<i64: 3, 32, 32>}, {pipeline_mode = #tpu.pipeline_mode<synchronous>, transform_indices = @transform_8, window_bounds = array<i64: 3, 1, 32>}, {transform_indices = @transform_9, window_bounds = array<i64: 4, 3, 2, 32>}]} {
    %c0 = arith.constant 0 : index
    %c0_0 = arith.constant 0 : index
    %c0_1 = arith.constant 0 : index
    %0 = vector.load %arg3[%c0, %c0_0, %c0_1] : memref<4x2x32xf32, #tpu.memory_space<vmem>>, vector<4x2x32xf32>
    %c0_2 = arith.constant 0 : index
    %c0_3 = arith.constant 0 : index
    %1 = vector.load %arg5[%c0_2, %c0_3] : memref<32x32xf32, #tpu.memory_space<vmem>>, vector<32x32xf32>
    %cst = arith.constant dense<0.000000e+00> : vector<4x2x32xf32>
    %2 = tpu.matmul %0, %1, %cst {dimension_numbers = #tpu.dot_dimension_numbers<[2], [0], [0, 1], [1], [0, 0, 0, 1, 1, 1], [], []>} : vector<4x2x32xf32>, vector<32x32xf32>, vector<4x2x32xf32> -> vector<4x2x32xf32>
    %c0_4 = arith.constant 0 : index
    %c0_5 = arith.constant 0 : index
    %c0_6 = arith.constant 0 : index
    %3 = vector.load %arg11[%c0_4, %c0_5, %c0_6] : memref<4x2x32xf32, #tpu.memory_space<vmem>>, vector<4x2x32xf32>
    tpu.vector_store %arg11[%c0_4, %c0_5, %c0_6], %2 {strides = array<i32>} : memref<4x2x32xf32, #tpu.memory_space<vmem>>, vector<4x2x32xf32>,
    %c0_7 = arith.constant 0 : index
    %c0_8 = arith.constant 0 : index
    %c0_9 = arith.constant 0 : index
    %4 = vector.load %arg2[%c0_7, %c0_8, %c0_9] : memref<2x8x32xf32, #tpu.memory_space<vmem>>, vector<2x8x32xf32>
    %c0_10 = arith.constant 0 : index
    %c0_11 = arith.constant 0 : index
    %5 = vector.load %arg4[%c0_10, %c0_11] : memref<2x8xf32, #tpu.memory_space<vmem>>, vector<2x8xf32>
    %c0_12 = arith.constant 0 : index
    %c0_13 = arith.constant 0 : index
    %6 = vector.load %arg6[%c0_12, %c0_13] : memref<1x32xf32, #tpu.memory_space<vmem>>, vector<1x32xf32>
    %7 = vector.shape_cast %6 : vector<1x32xf32> to vector<1x1x32xf32>
    %c0_i32 = arith.constant 0 : i32
    %c4_i32 = arith.constant 4 : i32
    %8 = arith.addi %c0_i32, %c4_i32 : i32
    %c1_i32 = arith.constant 1 : i32
    scf.for %arg14 = %c0_i32 to %8 step %c1_i32  : i32 {
      %c1_i32_84 = arith.constant 1 : i32
      %72 = arith.muli %arg14, %c1_i32_84 : i32
      %c0_i32_85 = arith.constant 0 : i32
      %73 = arith.addi %c0_i32_85, %72 : i32
      %74 = arith.index_cast %73 : i32 to index
      %c0_86 = arith.constant 0 : index
      %c0_87 = arith.constant 0 : index
      %75 = vector.load %arg11[%74, %c0_86, %c0_87] : memref<4x2x32xf32, #tpu.memory_space<vmem>>, vector<1x2x32xf32>
      %76 = vector.shape_cast %75 : vector<1x2x32xf32> to vector<2x32xf32>
      %77 = vector.shape_cast %76 : vector<2x32xf32> to vector<2x1x32xf32>
      %78 = vector.broadcast %77 : vector<2x1x32xf32> to vector<2x8x32xf32>
      %79 = arith.addf %4, %78 : vector<2x8x32xf32>
      %80 = math.tanh %79 : vector<2x8x32xf32>
      %81 = vector.broadcast %7 : vector<1x1x32xf32> to vector<2x8x32xf32>
      %82 = arith.mulf %80, %81 : vector<2x8x32xf32>
      %cst_88 = arith.constant dense<0.000000e+00> : vector<2x8xf32>
      %83 = vector.multi_reduction <add>, %82, %cst_88 [2] : vector<2x8x32xf32> to vector<2x8xf32>
      %84 = arith.mulf %83, %5 : vector<2x8xf32>
      %cst_89 = arith.constant dense<0xFF800000> : vector<2xf32>
      %85 = vector.multi_reduction <maximumf>, %84, %cst_89 [1] : vector<2x8xf32> to vector<2xf32>
      %86 = vector.shape_cast %85 : vector<2xf32> to vector<2x1xf32>
      %87 = vector.broadcast %86 : vector<2x1xf32> to vector<2x8xf32>
      %88 = arith.subf %84, %87 : vector<2x8xf32>
      %89 = math.exp %88 : vector<2x8xf32>
      %90 = arith.mulf %89, %5 : vector<2x8xf32>
      %cst_90 = arith.constant dense<0.000000e+00> : vector<2xf32>
      %91 = vector.multi_reduction <add>, %90, %cst_90 [1] : vector<2x8xf32> to vector<2xf32>
      %92 = vector.shape_cast %91 : vector<2xf32> to vector<2x1xf32>
      %cst_91 = arith.constant 9.99999997E-7 : f32
      %93 = vector.broadcast %cst_91 : f32 to vector<2x1xf32>
      %94 = arith.addf %92, %93 : vector<2x1xf32>
      %95 = tpu.reciprocal %94 {approx = true} : vector<2x1xf32> -> vector<2x1xf32>
      %96 = arith.mulf %94, %95 : vector<2x1xf32>
      %cst_92 = arith.constant 2.000000e+00 : f32
      %97 = vector.broadcast %cst_92 : f32 to vector<2x1xf32>
      %98 = arith.subf %97, %96 : vector<2x1xf32>
      %99 = arith.mulf %95, %98 : vector<2x1xf32>
      %100 = vector.broadcast %99 : vector<2x1xf32> to vector<2x8xf32>
      %101 = arith.mulf %90, %100 : vector<2x8xf32>
      %102 = arith.index_cast %73 : i32 to index
      %c0_93 = arith.constant 0 : index
      %c0_94 = arith.constant 0 : index
      %103 = vector.load %arg12[%102, %c0_93, %c0_94] : memref<4x2x8xf32, #tpu.memory_space<vmem>>, vector<1x2x8xf32>
      %104 = vector.shape_cast %103 : vector<1x2x8xf32> to vector<2x8xf32>
      %105 = vector.shape_cast %101 : vector<2x8xf32> to vector<1x2x8xf32>
      tpu.vector_store %arg12[%102, %c0_93, %c0_94], %105 {strides = array<i32>} : memref<4x2x8xf32, #tpu.memory_space<vmem>>, vector<1x2x8xf32>,
    }
    %c4_i32_14 = arith.constant 4 : i32
    %c0_15 = arith.constant 0 : index
    %c0_16 = arith.constant 0 : index
    %c0_17 = arith.constant 0 : index
    %9 = vector.load %arg12[%c0_15, %c0_16, %c0_17] : memref<4x2x8xf32, #tpu.memory_space<vmem>>, vector<4x1x8xf32>
    %10 = vector.shape_cast %9 : vector<4x1x8xf32> to vector<4x8xf32>
    %c0_18 = arith.constant 0 : index
    %c0_19 = arith.constant 0 : index
    %c0_20 = arith.constant 0 : index
    %11 = vector.load %arg1[%c0_18, %c0_19, %c0_20] : memref<2x8x32xf32, #tpu.memory_space<vmem>>, vector<1x8x32xf32>
    %12 = vector.shape_cast %11 : vector<1x8x32xf32> to vector<8x32xf32>
    %cst_21 = arith.constant dense<0.000000e+00> : vector<4x32xf32>
    %13 = tpu.matmul %10, %12, %cst_21 {dimension_numbers = #tpu.dot_dimension_numbers<[1], [0], [0], [1], [0, 0, 1, 1], [], []>} : vector<4x8xf32>, vector<8x32xf32>, vector<4x32xf32> -> vector<4x32xf32>
    %c0_22 = arith.constant 0 : index
    %c0_23 = arith.constant 0 : index
    %c0_24 = arith.constant 0 : index
    %14 = vector.load %arg13[%c0_22, %c0_23, %c0_24] : memref<4x2x32xf32, #tpu.memory_space<vmem>>, vector<4x1x32xf32>
    %15 = vector.shape_cast %14 : vector<4x1x32xf32> to vector<4x32xf32>
    %16 = vector.shape_cast %13 : vector<4x32xf32> to vector<4x1x32xf32>
    tpu.vector_store %arg13[%c0_22, %c0_23, %c0_24], %16 {strides = array<i32>} : memref<4x2x32xf32, #tpu.memory_space<vmem>>, vector<4x1x32xf32>,
    %c0_25 = arith.constant 0 : index
    %c1 = arith.constant 1 : index
    %c0_26 = arith.constant 0 : index
    %17 = vector.load %arg12[%c0_25, %c1, %c0_26] : memref<4x2x8xf32, #tpu.memory_space<vmem>>, vector<4x1x8xf32>
    %18 = vector.shape_cast %17 : vector<4x1x8xf32> to vector<4x8xf32>
    %c1_27 = arith.constant 1 : index
    %c0_28 = arith.constant 0 : index
    %c0_29 = arith.constant 0 : index
    %19 = vector.load %arg1[%c1_27, %c0_28, %c0_29] : memref<2x8x32xf32, #tpu.memory_space<vmem>>, vector<1x8x32xf32>
    %20 = vector.shape_cast %19 : vector<1x8x32xf32> to vector<8x32xf32>
    %cst_30 = arith.constant dense<0.000000e+00> : vector<4x32xf32>
    %21 = tpu.matmul %18, %20, %cst_30 {dimension_numbers = #tpu.dot_dimension_numbers<[1], [0], [0], [1], [0, 0, 1, 1], [], []>} : vector<4x8xf32>, vector<8x32xf32>, vector<4x32xf32> -> vector<4x32xf32>
    %c0_31 = arith.constant 0 : index
    %c1_32 = arith.constant 1 : index
    %c0_33 = arith.constant 0 : index
    %22 = vector.load %arg13[%c0_31, %c1_32, %c0_33] : memref<4x2x32xf32, #tpu.memory_space<vmem>>, vector<4x1x32xf32>
    %23 = vector.shape_cast %22 : vector<4x1x32xf32> to vector<4x32xf32>
    %24 = vector.shape_cast %21 : vector<4x32xf32> to vector<4x1x32xf32>
    tpu.vector_store %arg13[%c0_31, %c1_32, %c0_33], %24 {strides = array<i32>} : memref<4x2x32xf32, #tpu.memory_space<vmem>>, vector<4x1x32xf32>,
    %c0_34 = arith.constant 0 : index
    %c0_35 = arith.constant 0 : index
    %c0_36 = arith.constant 0 : index
    %25 = vector.load %arg3[%c0_34, %c0_35, %c0_36] : memref<4x2x32xf32, #tpu.memory_space<vmem>>, vector<4x2x32xf32>
    %c0_37 = arith.constant 0 : index
    %c0_38 = arith.constant 0 : index
    %c0_39 = arith.constant 0 : index
    %26 = vector.load %arg13[%c0_37, %c0_38, %c0_39] : memref<4x2x32xf32, #tpu.memory_space<vmem>>, vector<4x2x32xf32>
    %c0_40 = arith.constant 0 : index
    %c0_41 = arith.constant 0 : index
    %c0_42 = arith.constant 0 : index
    %27 = vector.load %arg7[%c0_40, %c0_41, %c0_42] : memref<3x32x32xf32, #tpu.memory_space<vmem>>, vector<1x32x32xf32>
    %28 = vector.shape_cast %27 : vector<1x32x32xf32> to vector<32x32xf32>
    %cst_43 = arith.constant dense<0.000000e+00> : vector<4x2x32xf32>
    %29 = tpu.matmul %25, %28, %cst_43 {dimension_numbers = #tpu.dot_dimension_numbers<[2], [0], [0, 1], [1], [0, 0, 0, 1, 1, 1], [], []>} : vector<4x2x32xf32>, vector<32x32xf32>, vector<4x2x32xf32> -> vector<4x2x32xf32>
    %c0_44 = arith.constant 0 : index
    %c0_45 = arith.constant 0 : index
    %c0_46 = arith.constant 0 : index
    %30 = vector.load %arg8[%c0_44, %c0_45, %c0_46] : memref<3x32x32xf32, #tpu.memory_space<vmem>>, vector<1x32x32xf32>
    %31 = vector.shape_cast %30 : vector<1x32x32xf32> to vector<32x32xf32>
    %cst_47 = arith.constant dense<0.000000e+00> : vector<4x2x32xf32>
    %32 = tpu.matmul %26, %31, %cst_47 {dimension_numbers = #tpu.dot_dimension_numbers<[2], [0], [0, 1], [1], [0, 0, 0, 1, 1, 1], [], []>} : vector<4x2x32xf32>, vector<32x32xf32>, vector<4x2x32xf32> -> vector<4x2x32xf32>
    %33 = arith.addf %29, %32 : vector<4x2x32xf32>
    %c0_48 = arith.constant 0 : index
    %c0_49 = arith.constant 0 : index
    %c0_50 = arith.constant 0 : index
    %34 = vector.load %arg9[%c0_48, %c0_49, %c0_50] : memref<3x1x32xf32, #tpu.memory_space<vmem>>, vector<1x1x32xf32>
    %35 = vector.shape_cast %34 : vector<1x1x32xf32> to vector<1x32xf32>
    %36 = vector.shape_cast %35 : vector<1x32xf32> to vector<1x1x32xf32>
    %37 = vector.broadcast %36 : vector<1x1x32xf32> to vector<4x2x32xf32>
    %38 = arith.addf %33, %37 : vector<4x2x32xf32>
    %c0_51 = arith.constant 0 : index
    %c0_52 = arith.constant 0 : index
    %c0_53 = arith.constant 0 : index
    %c0_54 = arith.constant 0 : index
    %39 = vector.load %arg10[%c0_51, %c0_52, %c0_53, %c0_54] : memref<4x3x2x32xf32, #tpu.memory_space<vmem>>, vector<4x1x2x32xf32>
    %40 = vector.shape_cast %39 : vector<4x1x2x32xf32> to vector<4x2x32xf32>
    %41 = vector.shape_cast %38 : vector<4x2x32xf32> to vector<4x1x2x32xf32>
    tpu.vector_store %arg10[%c0_51, %c0_52, %c0_53, %c0_54], %41 {strides = array<i32>} : memref<4x3x2x32xf32, #tpu.memory_space<vmem>>, vector<4x1x2x32xf32>,
    %c1_55 = arith.constant 1 : index
    %c0_56 = arith.constant 0 : index
    %c0_57 = arith.constant 0 : index
    %42 = vector.load %arg7[%c1_55, %c0_56, %c0_57] : memref<3x32x32xf32, #tpu.memory_space<vmem>>, vector<1x32x32xf32>
    %43 = vector.shape_cast %42 : vector<1x32x32xf32> to vector<32x32xf32>
    %cst_58 = arith.constant dense<0.000000e+00> : vector<4x2x32xf32>
    %44 = tpu.matmul %25, %43, %cst_58 {dimension_numbers = #tpu.dot_dimension_numbers<[2], [0], [0, 1], [1], [0, 0, 0, 1, 1, 1], [], []>} : vector<4x2x32xf32>, vector<32x32xf32>, vector<4x2x32xf32> -> vector<4x2x32xf32>
    %c1_59 = arith.constant 1 : index
    %c0_60 = arith.constant 0 : index
    %c0_61 = arith.constant 0 : index
    %45 = vector.load %arg8[%c1_59, %c0_60, %c0_61] : memref<3x32x32xf32, #tpu.memory_space<vmem>>, vector<1x32x32xf32>
    %46 = vector.shape_cast %45 : vector<1x32x32xf32> to vector<32x32xf32>
    %cst_62 = arith.constant dense<0.000000e+00> : vector<4x2x32xf32>
    %47 = tpu.matmul %26, %46, %cst_62 {dimension_numbers = #tpu.dot_dimension_numbers<[2], [0], [0, 1], [1], [0, 0, 0, 1, 1, 1], [], []>} : vector<4x2x32xf32>, vector<32x32xf32>, vector<4x2x32xf32> -> vector<4x2x32xf32>
    %48 = arith.addf %44, %47 : vector<4x2x32xf32>
    %c1_63 = arith.constant 1 : index
    %c0_64 = arith.constant 0 : index
    %c0_65 = arith.constant 0 : index
    %49 = vector.load %arg9[%c1_63, %c0_64, %c0_65] : memref<3x1x32xf32, #tpu.memory_space<vmem>>, vector<1x1x32xf32>
    %50 = vector.shape_cast %49 : vector<1x1x32xf32> to vector<1x32xf32>
    %51 = vector.shape_cast %50 : vector<1x32xf32> to vector<1x1x32xf32>
    %52 = vector.broadcast %51 : vector<1x1x32xf32> to vector<4x2x32xf32>
    %53 = arith.addf %48, %52 : vector<4x2x32xf32>
    %c0_66 = arith.constant 0 : index
    %c1_67 = arith.constant 1 : index
    %c0_68 = arith.constant 0 : index
    %c0_69 = arith.constant 0 : index
    %54 = vector.load %arg10[%c0_66, %c1_67, %c0_68, %c0_69] : memref<4x3x2x32xf32, #tpu.memory_space<vmem>>, vector<4x1x2x32xf32>
    %55 = vector.shape_cast %54 : vector<4x1x2x32xf32> to vector<4x2x32xf32>
    %56 = vector.shape_cast %53 : vector<4x2x32xf32> to vector<4x1x2x32xf32>
    tpu.vector_store %arg10[%c0_66, %c1_67, %c0_68, %c0_69], %56 {strides = array<i32>} : memref<4x3x2x32xf32, #tpu.memory_space<vmem>>, vector<4x1x2x32xf32>,
    %c2 = arith.constant 2 : index
    %c0_70 = arith.constant 0 : index
    %c0_71 = arith.constant 0 : index
    %57 = vector.load %arg7[%c2, %c0_70, %c0_71] : memref<3x32x32xf32, #tpu.memory_space<vmem>>, vector<1x32x32xf32>
    %58 = vector.shape_cast %57 : vector<1x32x32xf32> to vector<32x32xf32>
    %cst_72 = arith.constant dense<0.000000e+00> : vector<4x2x32xf32>
    %59 = tpu.matmul %25, %58, %cst_72 {dimension_numbers = #tpu.dot_dimension_numbers<[2], [0], [0, 1], [1], [0, 0, 0, 1, 1, 1], [], []>} : vector<4x2x32xf32>, vector<32x32xf32>, vector<4x2x32xf32> -> vector<4x2x32xf32>
    %c2_73 = arith.constant 2 : index
    %c0_74 = arith.constant 0 : index
    %c0_75 = arith.constant 0 : index
    %60 = vector.load %arg8[%c2_73, %c0_74, %c0_75] : memref<3x32x32xf32, #tpu.memory_space<vmem>>, vector<1x32x32xf32>
    %61 = vector.shape_cast %60 : vector<1x32x32xf32> to vector<32x32xf32>
    %cst_76 = arith.constant dense<0.000000e+00> : vector<4x2x32xf32>
    %62 = tpu.matmul %26, %61, %cst_76 {dimension_numbers = #tpu.dot_dimension_numbers<[2], [0], [0, 1], [1], [0, 0, 0, 1, 1, 1], [], []>} : vector<4x2x32xf32>, vector<32x32xf32>, vector<4x2x32xf32> -> vector<4x2x32xf32>
    %63 = arith.addf %59, %62 : vector<4x2x32xf32>
    %c2_77 = arith.constant 2 : index
    %c0_78 = arith.constant 0 : index
    %c0_79 = arith.constant 0 : index
    %64 = vector.load %arg9[%c2_77, %c0_78, %c0_79] : memref<3x1x32xf32, #tpu.memory_space<vmem>>, vector<1x1x32xf32>
    %65 = vector.shape_cast %64 : vector<1x1x32xf32> to vector<1x32xf32>
    %66 = vector.shape_cast %65 : vector<1x32xf32> to vector<1x1x32xf32>
    %67 = vector.broadcast %66 : vector<1x1x32xf32> to vector<4x2x32xf32>
    %68 = arith.addf %63, %67 : vector<4x2x32xf32>
    %c0_80 = arith.constant 0 : index
    %c2_81 = arith.constant 2 : index
    %c0_82 = arith.constant 0 : index
    %c0_83 = arith.constant 0 : index
    %69 = vector.load %arg10[%c0_80, %c2_81, %c0_82, %c0_83] : memref<4x3x2x32xf32, #tpu.memory_space<vmem>>, vector<4x1x2x32xf32>
    %70 = vector.shape_cast %69 : vector<4x1x2x32xf32> to vector<4x2x32xf32>
    %71 = vector.shape_cast %68 : vector<4x2x32xf32> to vector<4x1x2x32xf32>
    tpu.vector_store %arg10[%c0_80, %c2_81, %c0_82, %c0_83], %71 {strides = array<i32>} : memref<4x3x2x32xf32, #tpu.memory_space<vmem>>, vector<4x1x2x32xf32>,
    return
  }
  func.func @transform_0(%arg0: i32) -> (i32, i32, i32) {
    %c0_i32 = arith.constant 0 : i32
    %c0_i32_0 = arith.constant 0 : i32
    %c0_i32_1 = arith.constant 0 : i32
    %c0_i32_2 = arith.constant 0 : i32
    return %c0_i32, %c0_i32_0, %c0_i32_1 : i32, i32, i32
  }
  func.func @transform_1(%arg0: i32) -> (i32, i32, i32) {
    %c0_i32 = arith.constant 0 : i32
    %c0_i32_0 = arith.constant 0 : i32
    %c0_i32_1 = arith.constant 0 : i32
    %c0_i32_2 = arith.constant 0 : i32
    return %c0_i32, %c0_i32_0, %c0_i32_1 : i32, i32, i32
  }
  func.func @transform_2(%arg0: i32) -> (i32, i32, i32) {
    %c0_i32 = arith.constant 0 : i32
    %c0_i32_0 = arith.constant 0 : i32
    %c0_i32_1 = arith.constant 0 : i32
    return %arg0, %c0_i32, %c0_i32_0 : i32, i32, i32
  }
  func.func @transform_3(%arg0: i32) -> (i32, i32) {
    %c0_i32 = arith.constant 0 : i32
    %c0_i32_0 = arith.constant 0 : i32
    %c0_i32_1 = arith.constant 0 : i32
    return %c0_i32, %c0_i32_0 : i32, i32
  }
  func.func @transform_4(%arg0: i32) -> (i32, i32) {
    %c0_i32 = arith.constant 0 : i32
    %c0_i32_0 = arith.constant 0 : i32
    %c0_i32_1 = arith.constant 0 : i32
    return %c0_i32, %c0_i32_0 : i32, i32
  }
  func.func @transform_5(%arg0: i32) -> (i32, i32) {
    %c0_i32 = arith.constant 0 : i32
    %c0_i32_0 = arith.constant 0 : i32
    %c0_i32_1 = arith.constant 0 : i32
    return %c0_i32, %c0_i32_0 : i32, i32
  }
  func.func @transform_6(%arg0: i32) -> (i32, i32, i32) {
    %c0_i32 = arith.constant 0 : i32
    %c0_i32_0 = arith.constant 0 : i32
    %c0_i32_1 = arith.constant 0 : i32
    %c0_i32_2 = arith.constant 0 : i32
    return %c0_i32, %c0_i32_0, %c0_i32_1 : i32, i32, i32
  }
  func.func @transform_7(%arg0: i32) -> (i32, i32, i32) {
    %c0_i32 = arith.constant 0 : i32
    %c0_i32_0 = arith.constant 0 : i32
    %c0_i32_1 = arith.constant 0 : i32
    %c0_i32_2 = arith.constant 0 : i32
    return %c0_i32, %c0_i32_0, %c0_i32_1 : i32, i32, i32
  }
  func.func @transform_8(%arg0: i32) -> (i32, i32, i32) {
    %c0_i32 = arith.constant 0 : i32
    %c0_i32_0 = arith.constant 0 : i32
    %c0_i32_1 = arith.constant 0 : i32
    %c0_i32_2 = arith.constant 0 : i32
    return %c0_i32, %c0_i32_0, %c0_i32_1 : i32, i32, i32
  }
  func.func @transform_9(%arg0: i32) -> (i32, i32, i32, i32) {
    %c0_i32 = arith.constant 0 : i32
    %c0_i32_0 = arith.constant 0 : i32
    %c0_i32_1 = arith.constant 0 : i32
    %c0_i32_2 = arith.constant 0 : i32
    return %arg0, %c0_i32, %c0_i32_0, %c0_i32_1 : i32, i32, i32, i32
  }
}

</mosaic_0001>

<bundles_post_ra>
// kernel: tpu_custom_call.1
= control target key start
LH: loop header
LB: loop body
LE: loop exit
PB: predicated region body
PF: predicated region fallthrough
CT: control target
= control target key end

     0   :  { %s2951_s0 = inlined_call_operand.hbm [shape: f32[2,8,32], index: 0, kind: input, shape index: {}]   ;;  %s2952_s1 = inlined_call_operand.hbm [shape: f32[2,8,32], index: 1, kind: input, shape index: {}]   ;;  %s2953_s2 = inlined_call_operand.hbm [shape: f32[8,2,32], index: 2, kind: input, shape index: {}]   ;;  %s2954_s3 = inlined_call_operand.vmem [shape: f32[2,8], index: 3, kind: input, shape index: {}]   ;;  %s2955_s4 = inlined_call_operand.hbm [shape: f32[32,32], index: 4, kind: input, shape index: {}]   ;;  %s2956_s5 = inlined_call_operand.vmem [shape: f32[1,32], index: 5, kind: input, shape index: {}]   ;;  %s2957_s6 = inlined_call_operand.hbm [shape: f32[3,32,32], index: 6, kind: input, shape index: {}]   ;;  %s2958_s7 = inlined_call_operand.hbm [shape: f32[3,32,32], index: 7, kind: input, shape index: {}]   ;;  %s2959_s8 = inlined_call_operand.vmem [shape: f32[3,1,32], index: 8, kind: input, shape index: {}]   ;;  %s2960_s9 = inlined_call_operand.hbm [shape: f32[8,3,2,32], index: 9, kind: output, shape index: {}]  }
   0x1   :  { %2967 = sst [smem:[#allocation24_spill]] %s2951_s0 }
   0x2   :  { %2968 = sst [smem:[#allocation25_spill]] %s2960_s9 }
   0x3   :  { %14 = vsyncpa [#allocation6], 0 }
   0x4   :  { %15 = vsyncpa [#allocation9], 0 }
   0x5   :  { %16 = vsyncpa [#allocation13], 0 }
   0x6   :  { %17 = vsyncpa [#allocation7], 0 }
   0x7   :  { %19 = vsyncpa [#allocation7 + $0x1], 0  ;;  %s2429_s30 = smov 0   ;;  %s2431_s10 = smov 0  }
   0x8   :  { %s2433_s11 = smov 0   ;;  %s2435_s12 = smov 0  }
   0x9 LB: > { %2969 = sst [smem:[#allocation22_spill]] %s2342_s30  ;;  %s2450_s13 = sadd.s32 4294967295, %s2354_s12   ;;  %s2354_s12 = sphi %s2435_s12, %s2998_s12   ;;  %s2350_s11 = sphi %s2433_s11, %s2997_s11   ;;  %s2346_s10 = sphi %s2431_s10, %s2996_s10   ;;  %s2342_s30 = sphi %s2429_s30, %s2995_s30  }
   0xa   : > { %s1745_s14 = sadd.s32 4294967294, %s2354_s12   ;;  %p87_p0 = scmp.ne.s32.totalorder %s2346_s10, %s2342_s30 }
   0xb   : > { %p2961_p1 = scmp.eq.s32.totalorder %s2450_s13, 0  ;;  %p243_p3 = scmp.eq.s32.totalorder %s1745_s14, 1 }
   0xc   : > { %p1746_p5 = scmp.ge.s32.totalorder %s2354_s12, 1  ;;  %p250_p7 = scmp.lt.s32.totalorder %s2354_s12, 3 }
   0xd   : > { %p2459_p4 = por %p2961_p1, %p87_p0  ;;  %p2464_p6 = por %p243_p3, %p87_p0 }
   0xe   : > { %p2469_p8 = pnand %p1746_p5, %p250_p7  ;;  %s2360_s18 = smov [#allocation5]  }
   0xf   : > { %s2970_s15 = scalar_select %p2459_p4, 1, 0 }
  0x10   : > { %s2971_s16 = scalar_select %p2464_p6, 1, 0 }
  0x11   : > { %s2973_s17 = scalar_select %p2469_p8, 1, 0 }
  0x12   : > { %2972 = sst [smem:[#allocation23_spill]] %s2971_s16  ;;  %s262_s19 = sshll.u32 %s2360_s18, 4  ;;  %s2473_s19 = int_to_ptr.vmem [resolvable:$true] %s262_s19 }
  0x13   : > { %p1993_p9 = pneg %p2469_p8  ;;  %s2361_s21 = smov [#allocation8]  }
  0x14   : > { %s275_s22 = sshll.u32 %s2361_s21, 4  ;;  %s2362_s23 = smov [#allocation12]   ;;  %s2484_s22 = int_to_ptr.vmem [resolvable:$true] %s275_s22 }
  0x15   : > { %p2480_p11 = pnand %p1993_p9, %p2961_p1  ;;  %s2486_s24 = sshll.u32 %s2362_s23, 4  ;;  %s308_s24 = int_to_ptr.vmem [resolvable:$true] %s2486_s24 }
  0x16   : > { %s2975_s0 = sld [smem:[#allocation24_spill]] }
  0x17   : > { %p2496_p13 = pneg %p2480_p11 }
  0x1c   : > { %s2098_s27 = scalar_lea.hbm %s2975_s0, 256 }
  0x1d   : > { %p2099_p12 = scmp.ne.s32.totalorder %s2975_s0, %s2098_s27  ;;  %p2105_p5 = scmp.lt.u32.totalorder %s2098_s27, %s2975_s0 }
  0x1f   : > { %p2101_p0 = pnand %p2496_p13, %p2099_p12 }
  0x21   : > { %p2102_p3 = pneg %p2101_p0 }
  0x23   : > { %p2107_p7 = pnand %p2105_p5, %p2102_p3 }
  0x25   : > { %2110 = shalt.err (!%p2107_p7)
}
  0x26   : > { %s2111_s23 = scalar_lea.vmem %s2473_s19, 256  ;;  %p2119_p2 = scmp.lt.s32.totalorder %s2473_s19, %s2473_s19 }
  0x27   : > { %p2112_p9 = scmp.ne.s32.totalorder %s2473_s19, %s2111_s23  ;;  %p2120_p6 = scmp.lt.s32.totalorder %s2111_s23, %s2111_s23 }
  0x29   : > { %p2114_p10 = pnand %p2112_p9, %p2496_p13  ;;  %p2121_p12 = por %p2120_p6, %p2119_p2 }
  0x2b   : > { %p2115_p1 = pneg %p2114_p10 }
  0x2d   : > { %p2122_p0 = pnand %p2121_p12, %p2115_p1 }
  0x2f   : > { %2125 = shalt.err (!%p2122_p0)
}
  0x30   : > { %s2363_s25 = smov 128   ;;  %s2364_s26 = smov 8  }
  0x31   : > { %1996 = dma.hbm_to_vmem [thread:$0]  (!%p2480_p11), %s2975_s0, 256, %s2473_s19, [#allocation6], %s2363_s25, %s2363_s25, %s2364_s26  }
  0x32   : > { %s2126_s21 = scalar_lea.hbm %s2952_s1, 256 }
  0x33   : > { %p2127_p1 = scmp.ne.s32.totalorder %s2952_s1, %s2126_s21  ;;  %p2133_p10 = scmp.lt.u32.totalorder %s2126_s21, %s2952_s1 }
  0x35   : > { %p2129_p2 = pnand %p2127_p1, %p2496_p13 }
  0x37   : > { %p2130_p6 = pneg %p2129_p2 }
  0x39   : > { %p2135_p3 = pnand %p2133_p10, %p2130_p6 }
  0x3b   : > { %2138 = shalt.err (!%p2135_p3)
}
  0x3c   : > { %s2139_s19 = scalar_lea.vmem %s2484_s22, 256  ;;  %p2147_p12 = scmp.lt.s32.totalorder %s2484_s22, %s2484_s22 }
  0x3d   : > { %p2140_p5 = scmp.ne.s32.totalorder %s2484_s22, %s2139_s19  ;;  %p2148_p0 = scmp.lt.s32.totalorder %s2139_s19, %s2139_s19 }
  0x3f   : > { %p2142_p7 = pnand %p2140_p5, %p2496_p13  ;;  %p2149_p1 = por %p2148_p0, %p2147_p12 }
  0x41   : > { %p2143_p9 = pneg %p2142_p7 }
  0x43   : > { %p2150_p2 = pnand %p2149_p1, %p2143_p9 }
  0x45   : > { %2153 = shalt.err (!%p2150_p2)
}
  0x46   : > { %1999 = dma.hbm_to_vmem [thread:$0]  (!%p2480_p11), %s2952_s1, 256, %s2484_s22, [#allocation9], %s2363_s25, %s2363_s25, %s2364_s26  }
  0x47   : > { %s2154_s28 = scalar_lea.hbm %s2957_s6, 1536 }
  0x48   : > { %p2155_p6 = scmp.ne.s32.totalorder %s2957_s6, %s2154_s28  ;;  %p2161_p5 = scmp.lt.u32.totalorder %s2154_s28, %s2957_s6 }
  0x4a   : > { %p2157_p10 = pnand %p2155_p6, %p2496_p13 }
  0x4c   : > { %p2158_p3 = pneg %p2157_p10 }
  0x4e   : > { %p2163_p7 = pnand %p2161_p5, %p2158_p3 }
  0x50   : > { %2166 = shalt.err (!%p2163_p7)
}
  0x51   : > { %s2167_s19 = scalar_lea.vmem %s308_s24, 1536  ;;  %p2175_p1 = scmp.lt.s32.totalorder %s308_s24, %s308_s24 }
  0x52   : > { %p2168_p9 = scmp.ne.s32.totalorder %s308_s24, %s2167_s19  ;;  %p2176_p2 = scmp.lt.s32.totalorder %s2167_s19, %s2167_s19 }
  0x54   : > { %p2170_p12 = pnand %p2168_p9, %p2496_p13  ;;  %p2177_p4 = por %p2176_p2, %p2175_p1 }
  0x56   : > { %p2171_p0 = pneg %p2170_p12 }
  0x58   : > { %p2178_p8 = pnand %p2177_p4, %p2171_p0 }
  0x5a   : > { %2181 = shalt.err (!%p2178_p8)
}
  0x5b   : > { %2005 = dma.hbm_to_vmem [thread:$0]  (!%p2480_p11), %s2957_s6, 1536, %s308_s24, [#allocation13], %s2363_s25, %s2363_s25, %s2364_s26  }
  0x5c   : > { %s2365_s30 = smov [#allocation11]   ;;  %s2366_s27 = smov [#allocation14]  }
  0x5d   : > { %s291_s16 = sshll.u32 %s2365_s30, 4  ;;  %s320_s28 = sshll.u32 %s2366_s27, 4  ;;  %s292_s16 = int_to_ptr.vmem [resolvable:$true] %s291_s16  ;;  %s321_s28 = int_to_ptr.vmem [resolvable:$true] %s320_s28 }
  0x5e   : > { %s2182_s21 = scalar_lea.hbm %s2955_s4, 512 }
  0x5f   : > { %p2183_p4 = scmp.ne.s32.totalorder %s2955_s4, %s2182_s21  ;;  %p2189_p10 = scmp.lt.u32.totalorder %s2182_s21, %s2955_s4 }
  0x61   : > { %p2185_p8 = pnand %p2183_p4, %p2496_p13 }
  0x63   : > { %p2186_p6 = pneg %p2185_p8 }
  0x65   : > { %p2191_p3 = pnand %p2189_p10, %p2186_p6 }
  0x67   : > { %2194 = shalt.err (!%p2191_p3)
}
  0x68   : > { %s2195_s24 = scalar_lea.vmem %s292_s16, 512  ;;  %p2203_p12 = scmp.lt.s32.totalorder %s292_s16, %s292_s16 }
  0x69   : > { %p2196_p5 = scmp.ne.s32.totalorder %s292_s16, %s2195_s24  ;;  %p2204_p0 = scmp.lt.s32.totalorder %s2195_s24, %s2195_s24 }
  0x6b   : > { %p2198_p7 = pnand %p2196_p5, %p2496_p13  ;;  %p2205_p1 = por %p2204_p0, %p2203_p12 }
  0x6d   : > { %p2199_p9 = pneg %p2198_p7 }
  0x6f   : > { %p2206_p2 = pnand %p2205_p1, %p2199_p9 }
  0x71   : > { %2209 = shalt.err (!%p2206_p2)
}
  0x72   : > { %2002 = dma.hbm_to_vmem [thread:$0]  (!%p2480_p11), %s2955_s4, 512, %s292_s16, [#allocation9], %s2363_s25, %s2363_s25, %s2364_s26  }
  0x73   : > { %s2210_s29 = scalar_lea.hbm %s2958_s7, 1536 }
  0x74   : > { %p2211_p4 = scmp.ne.s32.totalorder %s2958_s7, %s2210_s29  ;;  %p2217_p10 = scmp.lt.u32.totalorder %s2210_s29, %s2958_s7 }
  0x76   : > { %p2213_p8 = pnand %p2211_p4, %p2496_p13 }
  0x78   : > { %p2214_p6 = pneg %p2213_p8 }
  0x7a   : > { %p2219_p3 = pnand %p2217_p10, %p2214_p6 }
  0x7c   : > { %2222 = shalt.err (!%p2219_p3)
}
  0x7d   : > { %s2223_s22 = scalar_lea.vmem %s321_s28, 1536  ;;  %p2231_p12 = scmp.lt.s32.totalorder %s321_s28, %s321_s28 }
  0x7e   : > { %p2224_p5 = scmp.ne.s32.totalorder %s321_s28, %s2223_s22  ;;  %p2232_p0 = scmp.lt.s32.totalorder %s2223_s22, %s2223_s22 }
  0x80   : > { %p2226_p7 = pnand %p2224_p5, %p2496_p13  ;;  %p2233_p1 = por %p2232_p0, %p2231_p12 }
  0x82   : > { %p2227_p9 = pneg %p2226_p7 }
  0x84   : > { %p2234_p2 = pnand %p2233_p1, %p2227_p9 }
  0x86   : > { %2237 = shalt.err (!%p2234_p2)
}
  0x87   : > { %2008 = dma.hbm_to_vmem [thread:$0]  (!%p2480_p11), %s2958_s7, 1536, %s321_s28, [#allocation13], %s2363_s25, %s2363_s25, %s2364_s26  }
  0x88   : > { %s2611_s20 = sadd.s32 1, %s2354_s12   ;;  %s74_s0 = sadd.s32 1, %s2350_s11 }
  0x89   : > { %s71_s14 = ssub.s32 %s2354_s12, %s2611_s20  ;;  %p81_p4 = scmp.ne.s32.totalorder %s2350_s11, %s2346_s10 }
  0x8a   : > { %p72_p13 = scmp.eq.s32.totalorder %s71_s14, 0  ;;  %p82_p8 = scmp.eq.s32.totalorder %s2354_s12, 0 }
  0x8b   : > { %p2022_p6 = scmp.lt.s32.totalorder %s2354_s12, 2  ;;  %p2977_p3 = scmp.eq.s32.totalorder %s2450_s13, 1 }
  0x8c   : > { %s2621_s9 = scalar_select %p72_p13, %s2350_s11, %s74_s0  }
  0x8d   : > { %p83_p10 = por %p82_p8, %p81_p4  ;;  %p2625_p5 = por %p2977_p3, %p81_p4 }
  0x8e   : > { %s337_s27 = sand.u32 1, %s2354_s12   ;;  %s339_s29 = sand.u32 1, %s2350_s11  }
  0x8f   : > { %s1753_s25 = sshll.u32 %s339_s29, 3  ;;  %s1793_s26 = sshll.u32 %s2354_s12, 7 }
  0x90   : > { %s2635_s21 = scalar_lea.hbm %s2953_s2, %s1793_s26  ;;  %s341_s23 = scalar_lea.vmem [#allocation10], %s1753_s25 }
  0x91   : > { %s348_s19 = sshll.u32 %s341_s23, 4  ;;  %p2639_p11 = pnand %p2022_p6, %p83_p10  ;;  %s2637_s19 = int_to_ptr.vmem [resolvable:$true] %s348_s19 }
  0x92   : > { %s2643_s16 = scalar_lea.sflag [#allocation6], %s337_s27  ;;  %s2238_s24 = scalar_lea.hbm %s2635_s21, 128 }
  0x93   : > { %p2239_p7 = scmp.ne.s32.totalorder %s2635_s21, %s2238_s24  ;;  %p2240_p9 = pneg %p2639_p11 }
  0x94   : > { %s2243_s29 = scalar_lea.hbm %s2953_s2, 256  ;;  %p2244_p1 = scmp.lt.u32.totalorder %s2635_s21, %s2953_s2 }
  0x95   : > { %p2241_p12 = pnand %p2240_p9, %p2239_p7  ;;  %p2245_p2 = scmp.lt.u32.totalorder %s2243_s29, %s2238_s24 }
  0x96   : > { %p2247_p4 = scmp.lt.u32.totalorder %s2238_s24, %s2635_s21 }
  0x97   : > { %p2242_p0 = pneg %p2241_p12  ;;  %p2246_p13 = por %p2245_p2, %p2244_p1 }
  0x99   : > { %p2248_p8 = por %p2247_p4, %p2246_p13 }
  0x9b   : > { %p2249_p6 = pnand %p2248_p8, %p2242_p0 }
  0x9d   : > { %2252 = shalt.err (!%p2249_p6)
}
  0x9e   : > { %s2253_s27 = scalar_lea.vmem %s2637_s19, 128  ;;  %s2367_s28 = smov [#allocation10]  }
  0x9f   : > { %p2254_p10 = scmp.ne.s32.totalorder %s2637_s19, %s2253_s27  ;;  %s2258_s18 = sshll.u32 %s2367_s28, 4  ;;  %s2259_s18 = int_to_ptr.vmem [resolvable:$false] %s2258_s18 }
  0xa0   : > { %s2260_s23 = scalar_lea.vmem %s2259_s18, 256  ;;  %p2261_p12 = scmp.lt.s32.totalorder %s2637_s19, %s2259_s18 }
  0xa1   : > { %p2256_p3 = pnand %p2254_p10, %p2240_p9  ;;  %p2262_p1 = scmp.lt.s32.totalorder %s2260_s23, %s2253_s27 }
  0xa3   : > { %p2257_p7 = pneg %p2256_p3  ;;  %p2263_p2 = por %p2262_p1, %p2261_p12 }
  0xa5   : > { %p2264_p13 = pnand %p2263_p2, %p2257_p7 }
  0xa7   : > { %2267 = shalt.err (!%p2264_p13)
}
  0xa8   : > { %s2368_s24 = smov 32   ;;  %s2369_s14 = smov 2  }
  0xa9   : > { %2012 = dma.hbm_to_vmem [thread:$0]  (!%p2639_p11), %s2635_s21, 128, %s2637_s19, %s2643_s16, %s2368_s24, %s2368_s24, %s2369_s14  }
  0xaa   : > { %p2980_p9 = scmp.ne.s32.totalorder %s2973_s17, 0 }
  0xab   : > { %p2981_p0 = scmp.eq.s32.totalorder (!%p2980_p9), %s2450_s13, 0 }
  0xac   : > { %360 = sbr.rel (%p2980_p9) target bundleno = 1828 (0x724), region = 56 }
  0xb3   : > { %2317 = dma.done.wait (%p2981_p0), [#allocation6], 256   ;;  %p2982_p4 = pmov %p2981_p0 }
  0xb4   : > { %p2983_p8 = pmov %p2981_p0 }
  0xb5   : > { %2319 = vsyncadd (%p2982_p4), [#allocation6], 4294967040 }
  0xb6   : > { %2321 = dma.done.wait (%p2983_p8), [#allocation9], 256   ;;  %p2984_p6 = pmov %p2981_p0 }
  0xb7   : > { %s370_s22 = sand.u32 1, %s2450_s13   ;;  %s2683_s21 = sand.u32 1, %s2346_s10  }
  0xb8   : > { %2323 = vsyncadd (%p2984_p6), [#allocation9], 4294967040  ;;  %s1759_s17 = sshll.u32 %s2683_s21, 3  ;;  %s371_s19 = scalar_lea.sflag [#allocation6], %s370_s22 }
  0xb9   : > { %s2686_s16 = scalar_lea.vmem [#allocation10], %s1759_s17  ;;  %p2985_p11 = scmp.ne.s32.totalorder %s2970_s15, 0 }
  0xbb   : > { %2325 = dma.done.wait (%p2985_p11), %s371_s19, 128  }
  0xbc   : > { %2327 = vsyncadd (%p2985_p11), %s371_s19, 4294967168  ;;  %p2986_p10 = pmov %p2981_p0 }
  0xbd   : > { %p2987_p3 = pmov %p2981_p0 }
  0xbe   : > { %2329 = dma.done.wait (%p2986_p10), [#allocation9], 512  }
  0xbf   : > { %2331 = vsyncadd (%p2987_p3), [#allocation9], 4294966784  ;;  %p2988_p7 = pmov %p2981_p0 }
  0xc0   : > { %p2989_p12 = pmov %p2981_p0 }
  0xc1   : > { %2333 = dma.done.wait (%p2988_p7), [#allocation13], 3072  }
  0xc2   : > { %2335 = vsyncadd (%p2989_p12), [#allocation13], 4294964224  ;;  %s1967_s0 = smul.u32 24, %s2683_s21  ;;  %v2370_v0 = vmov 0.0|0.0   ;;  %vm2371_vm0 = vmmov 0   ;;  %v2372_v1 = vmov 0.0   ;;  %v440_v2 = vlaneseq }
  0xc3   : > { %1920 = vmatprep.subr.bf16.mxu0 %v2370_v0  ;;  %1841 = vmatprep.mubr.msk.f32.mxu0 %vm2371_vm0, %v2372_v1  ;;  %v2373_v3 = vmov 1983009808   ;;  %v2707_v7 = vld [vmem:[#allocation8] sm:$0xff]  ;;  %v2709_v8 = vld [vmem:[#allocation8 + $0x8] sm:$0xff]  ;;  %v2714_v9 = vld [vmem:[%s2954_s3] sm:$0x3] }
  0xc4   : > { %v438_v4 = vunpack.c.l.s4 %v2373_v3  ;;  %v2705_v6 = vshrl.u32 %v440_v2, 7  ;;  %v2719_v10 = vld [vmem:[%s2956_s5] ss:$0 sm:$0xff]  ;;  %v427_v11 = vld [vmem:[#allocation11] sm:$0xff]  ;;  %v428_v12 = vld [vmem:[#allocation11 + $0x8] sm:$0xff]  ;;  %vm452_vm1 = vcmask 261120  }
  0xc5   : > { %v1921_v13 = vpack.c.bf16 %v428_v12, %v427_v11  ;;  %v429_v14 = vld [vmem:[#allocation11 + $0x10] sm:$0xff]  ;;  %v430_v15 = vld [vmem:[#allocation11 + $0x18] sm:$0xff]  ;;  %vm547_vm2 = vcmask 254976   ;;  %s2740_s27 = scalar_lea.vmem [#allocation15], %s1967_s0  ;;  %s2742_s28 = smov 0  }
  0xc6   : > { %v439_v5 = vunpack.c.0.s8 %v438_v4  ;;  %v423_v16 = vld [vmem:[%s2686_s16] sm:$0x3]  ;;  %v424_v18 = vld [vmem:[%s2686_s16 + $0x2] sm:$0x3]  ;;  %v425_v19 = vld [vmem:[%s2686_s16 + $0x4] sm:$0x3]  ;;  %v1924_v21 = vpack.c.bf16 %v430_v15, %v429_v14 }
  0xc7   : > { %v426_v20 = vld [vmem:[%s2686_s16 + $0x6] sm:$0x3]  ;;  %1922 = vmatpush3.bf16.msra.mxu0 %v1921_v13  ;;  %v435_v22 = vcombine.low %v423_v16, %v424_v18 }
  0xc8   : > { %v2723_v17 = vsub.s32 %v439_v5, %v2705_v6  ;;  %v436_v23 = vcombine.low %v425_v19, %v426_v20  ;;  %1923 = vmatprep.subr.bf16.mxu0 %v2370_v0 }
  0xca   : > { %v443_v24 = vrot.slane %v435_v22, %v2723_v17  ;;  %v450_v25 = vrot.slane %v436_v23, %v2723_v17 }
  0xcb   : > { %1925 = vmatpush3.bf16.msra.mxu0 %v1924_v21 }
  0xcc   : > { %v451_v26 = vcombine.low %v443_v24, %v450_v25 }
  0xce   : > { %1842 = vmatmul.mubr.msk.f32.vlgmr.msra.gmra.mrb[0].mxu0 %vm452_vm1, %v451_v26 }
 0x1a1   : > { %v521_v27 = vpop.f32.mrb[0].mxu0 }
 0x1a2   : > { %v526_v28 = vcombine.high %v521_v27, %v521_v27  ;;  %v533_v29 = vrot.slane %v521_v27, %v2723_v17  ;;  %v1843_v30 = vpop.f32.mrb[1].mxu0 }
 0x1a4   : > { %v540_v31 = vrot.slane %v526_v28, %v2723_v17  ;;  %v541_v32 = vcombine.high %v533_v29, %v533_v29  ;;  %548 = vst.msk [vmem:[#allocation2] sm:$0x3] %vm547_vm2, %v533_v29 }
 0x1a6   : > { %v542_v33 = vcombine.high %v540_v31, %v540_v31  ;;  %549 = vst.msk [vmem:[#allocation2 + $0x2] sm:$0x3] %vm547_vm2, %v541_v32  ;;  %550 = vst.msk [vmem:[#allocation2 + $0x4] sm:$0x3] %vm547_vm2, %v540_v31 }
 0x1a8   : > { %551 = vst.msk [vmem:[#allocation2 + $0x6] sm:$0x3] %vm547_vm2, %v542_v33 }
 0x1a9 LB: >> { %v2748_v34 = vsub.s32 0, %v2705_v6  ;;  %v2751_v35 = vsub.s32 1, %v2705_v6  ;;  %v2374_v36 = vmov 1966171168   ;;  %s1764_s18 = sshll.u32 %s2358_s28, 1  ;;  %v2375_v56 = vmov 0   ;;  %s2358_s28 = sphi %s2742_s28, %s561_s28  }
 0x1aa   : >> { %v575_v37 = vunpack.c.l.s4 %v2374_v36  ;;  %s563_s23 = scalar_lea.vmem [#allocation2], %s1764_s18  ;;  %2086 = vset.pattern.permute.xlu0 %v2375_v56  ;;  %2087 = vset.pattern.permute.xlu1 %v2375_v56  ;;  %v644_v63 = vand.u32 127, %v440_v2  ;;  %vm653_vm3 = vcmask 1041409   ;;  %vm656_vm4 = vcmask 58368   ;;  %s736_s24 = scalar_lea.vmem [#allocation3], %s1764_s18 }
 0x1ab   : >> { %v620_v38 = vrot.slane %v2714_v9, %v2748_v34  ;;  %v627_v41 = vrot.slane %v2714_v9, %v2751_v35  ;;  %s561_s28 = sadd.s32 1, %s2358_s28  }
 0x1ac   : >> { %v576_v39 = vunpack.c.0.s8 %v575_v37  ;;  %v647_v3 = vsub.s32 %v644_v63, %v2705_v6  ;;  %p558_p1 = scmp.ge.s32.totalorder %s561_s28, 4  }
 0x1ad   : >> { %622 = vbcast.lane.b32.xlu1 %v620_v38, 256  ;;  %1844 = vmatprep.subr.mxu1 (%p558_p1), %v2372_v1  ;;  %vm751_vm5 = vcmask (%p558_p1), 1042434   ;;  %vm754_vm6 = vcmask (%p558_p1), 1043459   ;;  %vm756_vm7 = vcmask (%p558_p1), 64512   ;;  %vm858_vm8 = vcmask (%p558_p1), 253952   ;;  %s1968_s15 = smul.u32 (%p558_p1), 384, %s2450_s13 }
 0x1ae   : >> { %v2761_v42 = vsub.s32 %v576_v39, %v2705_v6  ;;  %1846 = vmatprep.mubr.msk.f32.mxu1 (%p558_p1), %vm2371_vm0, %v2372_v1  ;;  %1926 = vmatprep.subr.bf16.mxu0 (%p558_p1), %v2370_v0  ;;  %s1616_s29 = sshll.u32 (%p558_p1), %s2740_s27, 4  ;;  %s2990_s28 = sld [smem:[#allocation25_spill]] (%p558_p1)  ;;  %s2901_s29 = int_to_ptr.vmem [resolvable:$true] %s1616_s29 }
 0x1af   : >> { %v1765_v40 = vld.sshfl [vmem:[%s563_s23] sm:$0x11 pattern:$0x75316420]  ;;  %1862 = vmatprep.mubr.msk.f32.mxu0 (%p558_p1), %vm2371_vm0, %v2372_v1  ;;  %s1602_s13 = scalar_lea.sflag (%p558_p1), [#allocation7], %s2683_s21  ;;  %s2268_s23 = scalar_lea.vmem (%p558_p1), %s2901_s29, 384 }
 0x1b0   : >> { %v573_v43 = vcombine.high %v1765_v40, %v1765_v40  ;;  %v580_v44 = vrot.slane %v1765_v40, %v2761_v42  ;;  %p2269_p2 = scmp.ne.s32.totalorder (%p558_p1), %s2901_s29, %s2268_s23 }
 0x1b1   : >> { %629 = vbcast.lane.b32.xlu1 %v627_v41, 256 }
 0x1b2   : >> { %v587_v45 = vrot.slane %v573_v43, %v2761_v42  ;;  %v591_v46 = vrot.slane %v580_v44, %v2748_v34  ;;  %p2270_p13 = pnand (%p558_p1), %p2269_p2, %p2625_p5 }
 0x1b4   : >> { %v595_v47 = vrot.slane %v587_v45, %v2748_v34  ;;  %v598_v48 = vadd.f32 %v591_v46, %v2707_v7  ;;  %s2899_s18 = scalar_lea.hbm (%p558_p1), %s2990_s28, %s1968_s15  ;;  %p2271_p9 = pneg (%p558_p1), %p2270_p13 }
 0x1b6   : >> { %v599_v49 = vadd.f32 %v595_v47, %v2709_v8  ;;  %2088 = vtanh.f32 %v598_v48 }
 0x1b8   : >> { %2090 = vtanh.f32 %v599_v49 }
 0x1c0   : >> { %v2089_v50 = vpop.eup %2088 }
 0x1c1   : >> { %v608_v52 = vmul.f32 %v2089_v50, %v2719_v10 }
 0x1c2   : >> { %v2091_v51 = vpop.eup %2090 }
 0x1c3   : >> { %v609_v53 = vmul.f32 %v2091_v51, %v2719_v10  ;;  %v610_v54 = vsel %vm452_vm1, %v608_v52, 0.0 }
 0x1c4   : >> { %611 = vadd.xlane.f32.xlu0 %v610_v54 }
 0x1c5   : >> { %v613_v55 = vsel %vm452_vm1, %v609_v53, 0.0 }
 0x1c8   : >> { %614 = vadd.xlane.f32.xlu0 %v613_v55 }
 0x21f   : >> { %v623_v57 = vpop.permute.xlu1 %622 }
 0x223   : >> { %v630_v60 = vpop.permute.xlu1 %629 }
 0x251   : >> { %v612_v58 = vpop.xlane.xlu0 %611 }
 0x252   : >> { %v633_v59 = vmul.f32 %v623_v57, %v612_v58 }
 0x254   : >> { %638 = vperm.xlu0 %2086, %v633_v59  }
 0x255   : >> { %v615_v61 = vpop.xlane.xlu0 %614 }
 0x256   : >> { %v634_v62 = vmul.f32 %v630_v60, %v615_v61 }
 0x258   : >> { %641 = vperm.xlu1 %2087, %v634_v62  }
 0x2d3   : >> { %v639_v4 = vpop.permute.xlu0 %638 }
 0x2d4   : >> { %v648_v11 = vrot.slane %v639_v4, %v647_v3  ;;  %v992_v4 = vld [vmem:[#allocation12] sm:$0xff] (%p558_p1) }
 0x2d7   : >> { %v642_v5 = vpop.permute.xlu1 %641 }
 0x2d8   : >> { %v652_v12 = vrot.slane %v642_v5, %v647_v3  ;;  %v993_v5 = vld [vmem:[#allocation12 + $0x8] sm:$0xff] (%p558_p1) }
 0x2da   : >> { %v654_v13 = vsel %vm653_vm3, %v652_v12, %v648_v11  ;;  %v1933_v11 = vpack.c.bf16 (%p558_p1), %v993_v5, %v992_v4  ;;  %v994_v12 = vld [vmem:[#allocation12 + $0x10] sm:$0xff] (%p558_p1)  ;;  %v1416_v4 = vld [vmem:[#allocation12 + $0x58] sm:$0xff] (%p558_p1) }
 0x2db   : >> { %v657_v14 = vsel %vm656_vm4, %v654_v13, -inf  ;;  %v995_v13 = vld [vmem:[#allocation12 + $0x18] sm:$0xff] (%p558_p1) }
 0x2dc   : >> { %658 = vmax.xlane.f32.xlu1 %v657_v14  ;;  %v996_v14 = vld [vmem:[#allocation14] sm:$0xff] (%p558_p1) }
 0x369   : >> { %v659_v15 = vpop.xlane.xlu1 %658 }
 0x36a   : >> { %v664_v16 = vrot.slane %v659_v15, %v2748_v34  ;;  %v668_v18 = vrot.slane %v659_v15, %v2751_v35  ;;  %v1936_v15 = vpack.c.bf16 (%p558_p1), %v995_v13, %v994_v12  ;;  %v1224_v12 = vld [vmem:[#allocation12 + $0x20] sm:$0xff] (%p558_p1)  ;;  %v1225_v13 = vld [vmem:[#allocation12 + $0x28] sm:$0xff] (%p558_p1) }
 0x36c   : >> { %v671_v19 = vsub.f32 %v633_v59, %v664_v16  ;;  %v672_v20 = vsub.f32 %v634_v62, %v668_v18  ;;  %v997_v16 = vld [vmem:[#allocation14 + $0x8] sm:$0xff] (%p558_p1)  ;;  %v984_v18 = vld [vmem:[%s2686_s16] sm:$0x3] (%p558_p1) }
 0x36e   : >> { %v673_v21 = vmul.f32 1.442695, %v671_v19  ;;  %v675_v22 = vmul.f32 1.442695, %v672_v20  ;;  %v985_v19 = vld [vmem:[%s2686_s16 + $0x2] sm:$0x3] (%p558_p1)  ;;  %v1927_v20 = vpack.c.bf16 (%p558_p1), %v997_v16, %v996_v14  ;;  %v1945_v14 = vpack.c.bf16 (%p558_p1), %v1225_v13, %v1224_v12 }
 0x36f   : > { %v1227_v16 = vld [vmem:[#allocation12 + $0x38] sm:$0xff] (%p558_p1) }
 0x370   : >> { %2092 = vpow2.f32 %v673_v21  ;;  %v986_v21 = vld [vmem:[%s2686_s16 + $0x4] sm:$0x3] (%p558_p1)  ;;  %1928 = vmatpush3.bf16.msra.mxu0 (%p558_p1), %v1927_v20 }
 0x371   : >> { %2094 = vpow2.f32 %v675_v22  ;;  %v987_v22 = vld [vmem:[%s2686_s16 + $0x6] sm:$0x3] (%p558_p1)  ;;  %1929 = vmatprep.subr.bf16.mxu0 (%p558_p1), %v2370_v0 }
 0x37a   : >> { %v2093_v23 = vpop.eup %2092 }
 0x37b   : >> { %v2095_v24 = vpop.eup %2094  ;;  %v677_v25 = vmul.f32 %v2093_v23, %v623_v57  ;;  %v868_v57 = vld [vmem:[#allocation5 + $0x8] sm:$0xff] (%p558_p1)  ;;  %v1097_v23 = vcombine.low (%p558_p1), %v984_v18, %v985_v19 }
 0x37c   : >> { %v678_v26 = vmul.f32 %v2095_v24, %v630_v60  ;;  %v1418_v24 = vld [vmem:[#allocation14 + $0x40] sm:$0xff] (%p558_p1) }
 0x37d   : >> { %682 = vperm.xlu1 %2087, %v677_v25  }
 0x37e   : >> { %685 = vperm.xlu0 %2086, %v678_v26  }
 0x3fc   : >> { %v683_v27 = vpop.permute.xlu1 %682 }
 0x3fd   : >> { %v686_v28 = vpop.permute.xlu0 %685  ;;  %v690_v29 = vrot.slane %v683_v27, %v647_v3  ;;  %v998_v27 = vld [vmem:[#allocation14 + $0x10] sm:$0xff] (%p558_p1) }
 0x3fe   : >> { %v694_v30 = vrot.slane %v686_v28, %v647_v3  ;;  %v999_v28 = vld [vmem:[#allocation14 + $0x18] sm:$0xff] (%p558_p1) }
 0x400   : >> { %v695_v31 = vsel %vm653_vm3, %v694_v30, %v690_v29  ;;  %v1105_v29 = vrot.slane (%p558_p1), %v1097_v23, %v2723_v17  ;;  %v1930_v30 = vpack.c.bf16 (%p558_p1), %v999_v28, %v998_v27 }
 0x401   : >> { %v697_v32 = vsel %vm656_vm4, %v695_v31, 0.0 }
 0x402   : >> { %698 = vadd.xlane.f32.xlu0 %v697_v32  ;;  %1931 = vmatpush3.bf16.msra.mxu0 (%p558_p1), %v1930_v30 }
 0x403   : > { %1938 = vmatprep.subr.bf16.mxu0 (%p558_p1), %v2370_v0 }
 0x48f   : >> { %v699_v33 = vpop.xlane.xlu0 %698 }
 0x490   : >> { %v700_v36 = vadd.f32 1e-06, %v699_v33 }
 0x492   : >> { %2096 = vrcp.f32 %v700_v36 }
 0x49c   : >> { %v2097_v37 = vpop.eup %2096 }
 0x49d   : >> { %v702_v38 = vmul.f32 %v2097_v37, %v700_v36  ;;  %v1420_v36 = vld [vmem:[#allocation14 + $0x50] sm:$0xff] (%p558_p1) }
 0x49f   : >> { %v703_v39 = vsub.f32 2.0, %v702_v38 }
 0x4a1   : >> { %v704_v40 = vmul.f32 %v2097_v37, %v703_v39  ;;  %v1421_v37 = vld [vmem:[#allocation14 + $0x58] sm:$0xff] (%p558_p1) }
 0x4a2   : > { %v1954_v38 = vpack.c.bf16 (%p558_p1), %v1421_v37, %v1420_v36 }
 0x4a3   : >> { %v709_v41 = vrot.slane %v704_v40, %v2748_v34  ;;  %v713_v44 = vrot.slane %v704_v40, %v2751_v35  ;;  %v742_v34 = vld [vmem:[#allocation5] sm:$0xff] (%p558_p1) }
 0x4a4   : > { %1845 = vmatpush3.msra.mxu1 (%p558_p1), %v742_v34 }
 0x4a5   : >> { %v716_v43 = vmul.f32 %v709_v41, %v677_v25  ;;  %v717_v45 = vmul.f32 %v713_v44, %v678_v26  ;;  %1849 = vmatprep.subr.mxu1 (%p558_p1), %v2372_v1  ;;  %v1098_v25 = vcombine.low (%p558_p1), %v986_v21, %v987_v22  ;;  %v1419_v26 = vld [vmem:[#allocation14 + $0x48] sm:$0xff] (%p558_p1) }
 0x4a6   : > { %v1951_v32 = vpack.c.bf16 (%p558_p1), %v1419_v26, %v1418_v24  ;;  %v1771_v24 = vld [vmem:[%s2959_s8] ss:$0 sm:$0xff] (%p558_p1) }
 0x4a7   : >> { %721 = vperm.xlu1 %2087, %v716_v43   ;;  %v1112_v31 = vrot.slane (%p558_p1), %v1098_v25, %v2723_v17 }
 0x4a9   : > { %v2819_v33 = vcombine.low (%p558_p1), %v1105_v29, %v1112_v31 }
 0x4ab   : >> { %724 = vperm.xlu1 %2087, %v717_v45  }
 0x526   : >> { %v722_v46 = vpop.permute.xlu1 %721 }
 0x527   : >> { %v729_v48 = vrot.slane %v722_v46, %v647_v3 }
 0x528   : > { %560 = sbr.rel (!%p558_p1) target bundleno = 425 (0x1a9), region = 138 }
 0x52a   : >> { %v725_v47 = vpop.permute.xlu1 %724 }
 0x52b   : >> { %v733_v49 = vrot.slane %v725_v47, %v647_v3 }
 0x52d   : >> { %v734_v50 = vsel %vm653_vm3, %v733_v49, %v729_v48 }
 0x52e   : >> { %737 = vst.msk [vmem:[%s736_s24] sm:$0x3] %vm656_vm4, %v734_v50  ;;  %s2376_s24 = smov (%p558_p1), [#allocation15]  }
 0x52f   : > { %s2272_s14 = sshll.u32 %s2376_s24, 4  ;;  %s2273_s14 = int_to_ptr.vmem [resolvable:$false] %s2272_s14 }
 0x530   : > { %s2274_s22 = scalar_lea.vmem %s2273_s14, 768  ;;  %p2275_p0 = scmp.lt.s32.totalorder %s2901_s29, %s2273_s14 }
 0x531   : > { %p2276_p4 = scmp.lt.s32.totalorder %s2274_s22, %s2268_s23 }
 0x533   : > { %p2277_p8 = por %p2276_p4, %p2275_p0 }
 0x535   : > { %v738_v35 = vld [vmem:[#allocation3] sm:$0x1]  ;;  %v739_v51 = vld [vmem:[#allocation3 + $0x2] sm:$0x1]  ;;  %v740_v52 = vld [vmem:[#allocation3 + $0x4] sm:$0x1]  ;;  %p2278_p6 = pnand %p2277_p8, %p2271_p9 }
 0x536   : > { %v741_v53 = vld [vmem:[#allocation3 + $0x6] sm:$0x1]  ;;  %v747_v54 = vrot.slane %v739_v51, 7  ;;  %v750_v55 = vrot.slane %v740_v52, 6  ;;  %v863_v2 = vld [vmem:[#allocation3 + $0x1] sm:$0x1] }
 0x537   : > { %v753_v56 = vrot.slane %v741_v53, 5  ;;  %v864_v7 = vld [vmem:[#allocation3 + $0x3] sm:$0x1]  ;;  %v865_v8 = vld [vmem:[#allocation3 + $0x5] sm:$0x1] }
 0x538   : > { %v749_v6 = vsel %vm653_vm3, %v747_v54, %v738_v35  ;;  %v866_v9 = vld [vmem:[#allocation3 + $0x7] sm:$0x1]  ;;  %v873_v58 = vrot.slane %v864_v7, 7  ;;  %v875_v59 = vrot.slane %v865_v8, 6 }
 0x539   : > { %v752_v10 = vsel %vm751_vm5, %v750_v55, %v749_v6  ;;  %v877_v60 = vrot.slane %v866_v9, 5  ;;  %v1229_v7 = vld [vmem:[#allocation14 + $0x20] sm:$0xff]  ;;  %v1230_v9 = vld [vmem:[#allocation14 + $0x28] sm:$0xff] }
 0x53a   : > { %v755_v61 = vsel %vm754_vm6, %v753_v56, %v752_v10  ;;  %v874_v62 = vsel %vm653_vm3, %v873_v58, %v863_v2  ;;  %v1413_v10 = vld [vmem:[#allocation12 + $0x40] sm:$0xff] }
 0x53b   : > { %1847 = vmatmul.mubr.msk.f32.vlgmr.msra.gmra.mrb[0].mxu1 %vm756_vm7, %v755_v61  ;;  %v876_v63 = vsel %vm751_vm5, %v875_v59, %v874_v62  ;;  %v1939_v59 = vpack.c.bf16 %v1230_v9, %v1229_v7  ;;  %v1231_v61 = vld [vmem:[#allocation14 + $0x30] sm:$0xff] }
 0x53c   : > { %1850 = vmatpush3.msra.mxu1 %v868_v57  ;;  %1851 = vmatprep.mubr.msk.f32.mxu1 %vm2371_vm0, %v2372_v1  ;;  %v878_v3 = vsel %vm754_vm6, %v877_v60, %v876_v63  ;;  %v1232_v63 = vld [vmem:[#allocation14 + $0x38] sm:$0xff] }
 0x53d   : > { %1932 = vmatprep.subr.bf16.mxu1 %v2370_v0  ;;  %v1942_v5 = vpack.c.bf16 %v1232_v63, %v1231_v61 }
 0x53f   : > { %1852 = vmatmul.mubr.msk.f32.vlgmr.msra.gmra.mrb[2].mxu1 %vm756_vm7, %v878_v3  ;;  %v1415_v3 = vld [vmem:[#allocation12 + $0x50] sm:$0xff] }
 0x540   : > { %1873 = vmatprep.mubr.msk.f32.mxu1 %vm2371_vm0, %v2372_v1  ;;  %1934 = vmatpush3.bf16.msra.mxu1 %v1933_v11  ;;  %v1960_v11 = vpack.c.bf16 %v1416_v4, %v1415_v3 }
 0x541   : > { %1935 = vmatprep.subr.bf16.mxu1 %v2370_v0 }
 0x544   : > { %1937 = vmatpush3.bf16.msra.mxu1 %v1936_v15  ;;  %v1226_v15 = vld [vmem:[#allocation12 + $0x30] sm:$0xff] }
 0x545   : > { %1950 = vmatprep.subr.bf16.mxu1 %v2370_v0  ;;  %v1948_v18 = vpack.c.bf16 %v1227_v16, %v1226_v15 }
 0x547   : > { %1874 = vmatmul.mubr.msk.f32.vlgmr.msra.gmra.mrb[4].mxu1 %vm452_vm1, %v2819_v33 }
 0x548   : > { %1952 = vmatpush3.bf16.msra.mxu1 %v1951_v32  ;;  %1906 = vmatprep.mubr.msk.f32.mxu1 %vm2371_vm0, %v2372_v1  ;;  %v1783_v32 = vld [vmem:[%s2959_s8 + $0x2] ss:$0 sm:$0xff] }
 0x549   : > { %1953 = vmatprep.subr.bf16.mxu1 %v2370_v0 }
 0x54c   : > { %1955 = vmatpush3.bf16.msra.mxu1 %v1954_v38 }
 0x54d   : > { %1956 = vmatprep.subr.bf16.mxu1 %v2370_v0 }
 0x60e   : > { %v825_v39 = vpop.f32.mrb[0].mxu1 }
 0x60f   : > { %v836_v40 = vrot.slane %v825_v39, %v2761_v42  ;;  %v1848_v41 = vpop.f32.mrb[1].mxu1 }
 0x611   : > { %v837_v43 = vcombine.high %v836_v40, %v836_v40  ;;  %v844_v44 = vrot.slane %v836_v40, %v2761_v42 }
 0x612   : > { %v947_v45 = vpop.f32.mrb[2].mxu1 }
 0x613   : > { %v851_v46 = vrot.slane %v837_v43, %v2761_v42  ;;  %v852_v47 = vcombine.high %v844_v44, %v844_v44  ;;  %859 = vst.msk [vmem:[#allocation4] sm:$0x1] %vm858_vm8, %v844_v44  ;;  %v958_v48 = vrot.slane %v947_v45, %v2761_v42  ;;  %v1853_v49 = vpop.f32.mrb[3].mxu1 }
 0x615   : > { %v853_v50 = vcombine.high %v851_v46, %v851_v46  ;;  %860 = vst.msk [vmem:[#allocation4 + $0x2] sm:$0x1] %vm858_vm8, %v851_v46  ;;  %861 = vst.msk [vmem:[#allocation4 + $0x4] sm:$0x1] %vm858_vm8, %v852_v47  ;;  %v959_v34 = vcombine.high %v958_v48, %v958_v48  ;;  %v966_v35 = vrot.slane %v958_v48, %v2761_v42  ;;  %v1775_v48 = vld [vmem:[%s2959_s8 + $0x1] ss:$0 sm:$0xff] }
 0x617   : > { %862 = vst.msk [vmem:[#allocation4 + $0x6] sm:$0x1] %vm858_vm8, %v853_v50  ;;  %v973_v51 = vrot.slane %v959_v34, %v2761_v42  ;;  %v974_v52 = vcombine.high %v966_v35, %v966_v35  ;;  %980 = vst.msk [vmem:[#allocation4 + $0x1] sm:$0x1] %vm858_vm8, %v966_v35  ;;  %v1414_v42 = vld [vmem:[#allocation12 + $0x48] sm:$0xff] }
 0x618   : > { %v1957_v60 = vpack.c.bf16 %v1414_v42, %v1413_v10 }
 0x619   : > { %v975_v53 = vcombine.high %v973_v51, %v973_v51  ;;  %981 = vst.msk [vmem:[#allocation4 + $0x3] sm:$0x1] %vm858_vm8, %v973_v51  ;;  %982 = vst.msk [vmem:[#allocation4 + $0x5] sm:$0x1] %vm858_vm8, %v974_v52 }
 0x61a   : > { %v1182_v19 = vpop.f32.mrb[4].mxu1 }
 0x61b   : > { %983 = vst.msk [vmem:[#allocation4 + $0x7] sm:$0x1] %vm858_vm8, %v975_v53  ;;  %v1875_v20 = vpop.f32.mrb[5].mxu1 }
 0x61e   : > { %v988_v54 = vld [vmem:[#allocation4] sm:$0x3] }
 0x620   : > { %v989_v55 = vld [vmem:[#allocation4 + $0x2] sm:$0x3]  ;;  %v990_v2 = vld [vmem:[#allocation4 + $0x4] sm:$0x3] }
 0x621   : > { %v1004_v56 = vcombine.low %v988_v54, %v989_v55 }
 0x622   : > { %v991_v6 = vld [vmem:[#allocation4 + $0x6] sm:$0x3] }
 0x623   : > { %v1005_v8 = vcombine.low %v990_v2, %v991_v6  ;;  %v1012_v57 = vrot.slane %v1004_v56, %v2723_v17 }
 0x625   : > { %v1019_v58 = vrot.slane %v1005_v8, %v2723_v17 }
 0x627   : > { %v1020_v62 = vcombine.low %v1012_v57, %v1019_v58 }
 0x629   : > { %1863 = vmatmul.mubr.msk.f32.vlgmr.msra.gmra.mrb[2].mxu0 %vm452_vm1, %v1020_v62  ;;  %1907 = vmatmul.mubr.msk.f32.vlgmr.msra.gmra.mrb[6].mxu1 %vm452_vm1, %v1020_v62 }
 0x62a   : > { %1940 = vmatpush3.bf16.msra.mxu0 %v1939_v59  ;;  %1958 = vmatpush3.bf16.msra.mxu1 %v1957_v60 }
 0x62b   : > { %1941 = vmatprep.subr.bf16.mxu0 %v2370_v0  ;;  %1959 = vmatprep.subr.bf16.mxu1 %v2370_v0 }
 0x62c   : > { %1884 = vmatprep.mubr.msk.f32.mxu0 %vm2371_vm0, %v2372_v1  ;;  %1917 = vmatprep.mubr.msk.f32.mxu1 %vm2371_vm0, %v2372_v1 }
 0x62e   : > { %1943 = vmatpush3.bf16.msra.mxu0 %v1942_v5  ;;  %1961 = vmatpush3.bf16.msra.mxu1 %v1960_v11 }
 0x62f   : > { %1944 = vmatprep.subr.bf16.mxu0 %v2370_v0 }
 0x631   : > { %1885 = vmatmul.mubr.msk.f32.vlgmr.msra.gmra.mrb[4].mxu0 %vm452_vm1, %v1020_v62  ;;  %1918 = vmatmul.mubr.msk.f32.vlgmr.msra.gmra.mrb[6].mxu1 %vm452_vm1, %v2819_v33 }
 0x632   : > { %1946 = vmatpush3.bf16.msra.mxu0 %v1945_v14  ;;  %1895 = vmatprep.mubr.msk.f32.mxu0 %vm2371_vm0, %v2372_v1 }
 0x633   : > { %1947 = vmatprep.subr.bf16.mxu0 %v2370_v0 }
 0x636   : > { %1949 = vmatpush3.bf16.msra.mxu0 %v1948_v18 }
 0x639   : > { %1896 = vmatmul.mubr.msk.f32.vlgmr.msra.gmra.mrb[4].mxu0 %vm452_vm1, %v2819_v33 }
 0x6fc   : > { %v1089_v21 = vpop.f32.mrb[2].mxu0 }
 0x6fd   : > { %v1183_v22 = vadd.f32 %v1182_v19, %v1089_v21  ;;  %v1864_v23 = vpop.f32.mrb[3].mxu0 }
 0x6ff   : > { %v1187_v25 = vcombine.high %v1183_v22, %v1183_v22  ;;  %v1194_v1 = vrot.slane %v1183_v22, %v2723_v17 }
 0x701   : > { %v1201_v0 = vrot.slane %v1187_v25, %v2723_v17  ;;  %v1202_v26 = vcombine.high %v1194_v1, %v1194_v1  ;;  %v1215_v27 = vadd.f32 %v1771_v24, %v1194_v1 }
 0x703   : > { %v1203_v28 = vcombine.high %v1201_v0, %v1201_v0  ;;  %v1216_v29 = vadd.f32 %v1771_v24, %v1202_v26  ;;  %v1217_v30 = vadd.f32 %v1771_v24, %v1201_v0  ;;  %1219 = vst.msk [vmem:[%s2740_s27] sm:$0x3] %vm547_vm2, %v1215_v27 }
 0x704   : > { %v1558_v31 = vpop.f32.mrb[6].mxu1 }
 0x705   : > { %v1218_v33 = vadd.f32 %v1771_v24, %v1203_v28  ;;  %1220 = vst.msk [vmem:[%s2740_s27 + $0x6] sm:$0x3] %vm547_vm2, %v1216_v29  ;;  %1221 = vst.msk [vmem:[%s2740_s27 + $0xc] sm:$0x3] %vm547_vm2, %v1217_v30  ;;  %v1563_v36 = vcombine.high %v1558_v31, %v1558_v31  ;;  %v1570_v37 = vrot.slane %v1558_v31, %v2723_v17  ;;  %v1919_v38 = vpop.f32.mrb[7].mxu1 }
 0x707   : > { %1222 = vst.msk [vmem:[%s2740_s27 + $0x12] sm:$0x3] %vm547_vm2, %v1218_v33  ;;  %v1577_v39 = vrot.slane %v1563_v36, %v2723_v17  ;;  %v1578_v40 = vcombine.high %v1570_v37, %v1570_v37  ;;  %v1592_v41 = vadd.f32 %v1783_v32, %v1570_v37 }
 0x709   : > { %v1579_v43 = vcombine.high %v1577_v39, %v1577_v39  ;;  %v1593_v44 = vadd.f32 %v1783_v32, %v1578_v40  ;;  %v1594_v45 = vadd.f32 %v1783_v32, %v1577_v39  ;;  %1784 = vst.msk [vmem:[%s2740_s27 + $0x4] sm:$0x3] %vm547_vm2, %v1592_v41 }
 0x70b   : > { %v1595_v46 = vadd.f32 %v1783_v32, %v1579_v43  ;;  %1785 = vst.msk [vmem:[%s2740_s27 + $0xa] sm:$0x3] %vm547_vm2, %v1593_v44  ;;  %1786 = vst.msk [vmem:[%s2740_s27 + $0x10] sm:$0x3] %vm547_vm2, %v1594_v45 }
 0x70c   : > { %v1369_v47 = vpop.f32.mrb[4].mxu0 }
 0x70d   : > { %1787 = vst.msk [vmem:[%s2740_s27 + $0x16] sm:$0x3] %vm547_vm2, %v1595_v46  ;;  %v1374_v49 = vcombine.high %v1369_v47, %v1369_v47  ;;  %v1381_v50 = vrot.slane %v1369_v47, %v2723_v17  ;;  %v1897_v34 = vpop.f32.mrb[5].mxu0 }
 0x70f   : > { %v1388_v35 = vrot.slane %v1374_v49, %v2723_v17  ;;  %v1389_v51 = vcombine.high %v1381_v50, %v1381_v50  ;;  %v1403_v52 = vadd.f32 %v1775_v48, %v1381_v50 }
 0x711   : > { %v1390_v53 = vcombine.high %v1388_v35, %v1388_v35  ;;  %v1404_v54 = vadd.f32 %v1775_v48, %v1389_v51  ;;  %v1405_v55 = vadd.f32 %v1775_v48, %v1388_v35  ;;  %1776 = vst.msk [vmem:[%s2740_s27 + $0x2] sm:$0x3] %vm547_vm2, %v1403_v52 }
 0x713   : > { %v1406_v17 = vadd.f32 %v1775_v48, %v1390_v53  ;;  %1777 = vst.msk [vmem:[%s2740_s27 + $0x8] sm:$0x3] %vm547_vm2, %v1404_v54  ;;  %1778 = vst.msk [vmem:[%s2740_s27 + $0xe] sm:$0x3] %vm547_vm2, %v1405_v55 }
 0x715   : > { %1779 = vst.msk [vmem:[%s2740_s27 + $0x14] sm:$0x3] %vm547_vm2, %v1406_v17 }
 0x716   : > { %2281 = shalt.err (!%p2278_p6)
}
 0x717   : > { %s2282_s27 = scalar_lea.hbm %s2899_s18, 384  ;;  %s2286_s16 = scalar_lea.hbm %s2990_s28, 768 }
 0x718   : > { %p2283_p11 = scmp.ne.s32.totalorder %s2899_s18, %s2282_s27  ;;  %p2287_p7 = scmp.lt.u32.totalorder %s2899_s18, %s2990_s28 }
 0x719   : > { %p2288_p12 = scmp.lt.u32.totalorder %s2286_s16, %s2282_s27  ;;  %p2290_p2 = scmp.lt.u32.totalorder %s2282_s27, %s2899_s18 }
 0x71a   : > { %p2284_p10 = pnand %p2283_p11, %p2625_p5 }
 0x71b   : > { %p2289_p1 = por %p2288_p12, %p2287_p7 }
 0x71c   : > { %p2285_p3 = pneg %p2284_p10 }
 0x71d   : > { %p2291_p13 = por %p2290_p2, %p2289_p1 }
 0x71f   : > { %p2292_p9 = pnand %p2291_p13, %p2285_p3 }
 0x721   : > { %2295 = shalt.err (!%p2292_p9)
}
 0x722   : > { %s2377_s25 = smov 32   ;;  %s2378_s26 = smov 2  }
 0x723   : > { %1991 = dma.vmem_to_hbm [thread:$0]  (%p2625_p5), %s2901_s29, 384, %s2899_s18, %s1602_s13, %s2377_s25, %s2377_s25, %s2378_s26  }
 0x724 PF: > { %s2991_s23 = sld [smem:[#allocation22_spill]]  ;;  %s2992_s24 = sld [smem:[#allocation23_spill]] }
 0x725   : > { %p2994_p4 = scmp.ge.s32.totalorder %s2354_s12, 2 }
 0x72a   : > { %s1631_s14 = sand.u32 1, %s2991_s23   ;;  %p2993_p0 = scmp.ne.s32.totalorder %s2992_s24, 0 }
 0x72b   : > { %s1632_s22 = scalar_lea.sflag [#allocation7], %s1631_s14 }
 0x72c   : > { %p2014_p8 = pnand %p2994_p4, %p2993_p0 }
 0x72e   : > { %2337 = dma.done.wait (!%p2014_p8), %s1632_s22, 384  }
 0x72f   : > { %2339 = vsyncadd (!%p2014_p8), %s1632_s22, 4294966912  ;;  %p22_p6 = scmp.ge.s32.totalorder %s2611_s20, 4   ;;  %s2995_s30 = smov %s2346_s10 }
 0x730   : > { %s2996_s10 = smov %s2350_s11  ;;  %s2997_s11 = smov %s2621_s9 }
 0x731   : > { %s2998_s12 = smov %s2611_s20  ;;  %24 = sbr.rel (!%p22_p6) target bundleno = 9 (0x9), region = 149 }
 0x738   :  { %1637 = vsyncpa [#allocation6], 1 }
 0x739   :  { %1639 = vsyncpa [#allocation6 + $0x1], 1 }
 0x73a   :  { %1640 = vsyncpa [#allocation9], 1 }
 0x73b   :  { %1641 = vsyncpa [#allocation13], 1 }
 0x73c   :  { %1642 = vsyncpa [#allocation7], 1 }
 0x73d   :  { %1644 = vsyncpa [#allocation7 + $0x1], 1 }

// kernel: tpu_custom_call.1
= control target key start
LH: loop header
LB: loop body
LE: loop exit
PB: predicated region body
PF: predicated region fallthrough
CT: control target
= control target key end

     0   :  { %s2951_s0 = inlined_call_operand.hbm [shape: f32[2,8,32], index: 0, kind: input, shape index: {}]   ;;  %s2952_s1 = inlined_call_operand.hbm [shape: f32[2,8,32], index: 1, kind: input, shape index: {}]   ;;  %s2953_s2 = inlined_call_operand.hbm [shape: f32[8,2,32], index: 2, kind: input, shape index: {}]   ;;  %s2954_s3 = inlined_call_operand.vmem [shape: f32[2,8], index: 3, kind: input, shape index: {}]   ;;  %s2955_s4 = inlined_call_operand.hbm [shape: f32[32,32], index: 4, kind: input, shape index: {}]   ;;  %s2956_s5 = inlined_call_operand.vmem [shape: f32[1,32], index: 5, kind: input, shape index: {}]   ;;  %s2957_s6 = inlined_call_operand.hbm [shape: f32[3,32,32], index: 6, kind: input, shape index: {}]   ;;  %s2958_s7 = inlined_call_operand.hbm [shape: f32[3,32,32], index: 7, kind: input, shape index: {}]   ;;  %s2959_s8 = inlined_call_operand.vmem [shape: f32[3,1,32], index: 8, kind: input, shape index: {}]   ;;  %s2960_s9 = inlined_call_operand.hbm [shape: f32[8,3,2,32], index: 9, kind: output, shape index: {}]  }
   0x1   :  { %2967 = sst [smem:[#allocation24_spill]] %s2951_s0 }
   0x2   :  { %2968 = sst [smem:[#allocation25_spill]] %s2960_s9 }
   0x3   :  { %14 = vsyncpa [#allocation6], 0 }
   0x4   :  { %15 = vsyncpa [#allocation9], 0 }
   0x5   :  { %16 = vsyncpa [#allocation13], 0 }
   0x6   :  { %17 = vsyncpa [#allocation7], 0 }
   0x7   :  { %19 = vsyncpa [#allocation7 + $0x1], 0  ;;  %s2429_s30 = smov 0   ;;  %s2431_s10 = smov 0  }
   0x8   :  { %s2433_s11 = smov 0   ;;  %s2435_s12 = smov 0  }
   0x9 LB: > { %2969 = sst [smem:[#allocation22_spill]] %s2342_s30  ;;  %s2450_s13 = sadd.s32 4294967295, %s2354_s12   ;;  %s2354_s12 = sphi %s2435_s12, %s2998_s12   ;;  %s2350_s11 = sphi %s2433_s11, %s2997_s11   ;;  %s2346_s10 = sphi %s2431_s10, %s2996_s10   ;;  %s2342_s30 = sphi %s2429_s30, %s2995_s30  }
   0xa   : > { %s1745_s14 = sadd.s32 4294967294, %s2354_s12   ;;  %p87_p0 = scmp.ne.s32.totalorder %s2346_s10, %s2342_s30 }
   0xb   : > { %p2961_p1 = scmp.eq.s32.totalorder %s2450_s13, 0  ;;  %p243_p3 = scmp.eq.s32.totalorder %s1745_s14, 1 }
   0xc   : > { %p1746_p5 = scmp.ge.s32.totalorder %s2354_s12, 1  ;;  %p250_p7 = scmp.lt.s32.totalorder %s2354_s12, 3 }
   0xd   : > { %p2459_p4 = por %p2961_p1, %p87_p0  ;;  %p2464_p6 = por %p243_p3, %p87_p0 }
   0xe   : > { %p2469_p8 = pnand %p1746_p5, %p250_p7  ;;  %s2360_s18 = smov [#allocation5]  }
   0xf   : > { %s2970_s15 = scalar_select %p2459_p4, 1, 0 }
  0x10   : > { %s2971_s16 = scalar_select %p2464_p6, 1, 0 }
  0x11   : > { %s2973_s17 = scalar_select %p2469_p8, 1, 0 }
  0x12   : > { %2972 = sst [smem:[#allocation23_spill]] %s2971_s16  ;;  %s262_s19 = sshll.u32 %s2360_s18, 4  ;;  %s2473_s19 = int_to_ptr.vmem [resolvable:$true] %s262_s19 }
  0x13   : > { %p1993_p9 = pneg %p2469_p8  ;;  %s2361_s21 = smov [#allocation8]  }
  0x14   : > { %s275_s22 = sshll.u32 %s2361_s21, 4  ;;  %s2362_s23 = smov [#allocation12]   ;;  %s2484_s22 = int_to_ptr.vmem [resolvable:$true] %s275_s22 }
  0x15   : > { %p2480_p11 = pnand %p1993_p9, %p2961_p1  ;;  %s2486_s24 = sshll.u32 %s2362_s23, 4  ;;  %s308_s24 = int_to_ptr.vmem [resolvable:$true] %s2486_s24 }
  0x16   : > { %s2975_s0 = sld [smem:[#allocation24_spill]] }
  0x17   : > { %p2496_p13 = pneg %p2480_p11 }
  0x1c   : > { %s2098_s27 = scalar_lea.hbm %s2975_s0, 256 }
  0x1d   : > { %p2099_p12 = scmp.ne.s32.totalorder %s2975_s0, %s2098_s27  ;;  %p2105_p5 = scmp.lt.u32.totalorder %s2098_s27, %s2975_s0 }
  0x1f   : > { %p2101_p0 = pnand %p2496_p13, %p2099_p12 }
  0x21   : > { %p2102_p3 = pneg %p2101_p0 }
  0x23   : > { %p2107_p7 = pnand %p2105_p5, %p2102_p3 }
  0x25   : > { %2110 = shalt.err (!%p2107_p7)
}
  0x26   : > { %s2111_s23 = scalar_lea.vmem %s2473_s19, 256  ;;  %p2119_p2 = scmp.lt.s32.totalorder %s2473_s19, %s2473_s19 }
  0x27   : > { %p2112_p9 = scmp.ne.s32.totalorder %s2473_s19, %s2111_s23  ;;  %p2120_p6 = scmp.lt.s32.totalorder %s2111_s23, %s2111_s23 }
  0x29   : > { %p2114_p10 = pnand %p2112_p9, %p2496_p13  ;;  %p2121_p12 = por %p2120_p6, %p2119_p2 }
  0x2b   : > { %p2115_p1 = pneg %p2114_p10 }
  0x2d   : > { %p2122_p0 = pnand %p2121_p12, %p2115_p1 }
  0x2f   : > { %2125 = shalt.err (!%p2122_p0)
}
  0x30   : > { %s2363_s25 = smov 128   ;;  %s2364_s26 = smov 8  }
  0x31   : > { %1996 = dma.hbm_to_vmem [thread:$0]  (!%p2480_p11), %s2975_s0, 256, %s2473_s19, [#allocation6], %s2363_s25, %s2363_s25, %s2364_s26  }
  0x32   : > { %s2126_s21 = scalar_lea.hbm %s2952_s1, 256 }
  0x33   : > { %p2127_p1 = scmp.ne.s32.totalorder %s2952_s1, %s2126_s21  ;;  %p2133_p10 = scmp.lt.u32.totalorder %s2126_s21, %s2952_s1 }
  0x35   : > { %p2129_p2 = pnand %p2127_p1, %p2496_p13 }
  0x37   : > { %p2130_p6 = pneg %p2129_p2 }
  0x39   : > { %p2135_p3 = pnand %p2133_p10, %p2130_p6 }
  0x3b   : > { %2138 = shalt.err (!%p2135_p3)
}
  0x3c   : > { %s2139_s19 = scalar_lea.vmem %s2484_s22, 256  ;;  %p2147_p12 = scmp.lt.s32.totalorder %s2484_s22, %s2484_s22 }
  0x3d   : > { %p2140_p5 = scmp.ne.s32.totalorder %s2484_s22, %s2139_s19  ;;  %p2148_p0 = scmp.lt.s32.totalorder %s2139_s19, %s2139_s19 }
  0x3f   : > { %p2142_p7 = pnand %p2140_p5, %p2496_p13  ;;  %p2149_p1 = por %p2148_p0, %p2147_p12 }
  0x41   : > { %p2143_p9 = pneg %p2142_p7 }
  0x43   : > { %p2150_p2 = pnand %p2149_p1, %p2143_p9 }
  0x45   : > { %2153 = shalt.err (!%p2150_p2)
}
  0x46   : > { %1999 = dma.hbm_to_vmem [thread:$0]  (!%p2480_p11), %s2952_s1, 256, %s2484_s22, [#allocation9], %s2363_s25, %s2363_s25, %s2364_s26  }
  0x47   : > { %s2154_s28 = scalar_lea.hbm %s2957_s6, 1536 }
  0x48   : > { %p2155_p6 = scmp.ne.s32.totalorder %s2957_s6, %s2154_s28  ;;  %p2161_p5 = scmp.lt.u32.totalorder %s2154_s28, %s2957_s6 }
  0x4a   : > { %p2157_p10 = pnand %p2155_p6, %p2496_p13 }
  0x4c   : > { %p2158_p3 = pneg %p2157_p10 }
  0x4e   : > { %p2163_p7 = pnand %p2161_p5, %p2158_p3 }
  0x50   : > { %2166 = shalt.err (!%p2163_p7)
}
  0x51   : > { %s2167_s19 = scalar_lea.vmem %s308_s24, 1536  ;;  %p2175_p1 = scmp.lt.s32.totalorder %s308_s24, %s308_s24 }
  0x52   : > { %p2168_p9 = scmp.ne.s32.totalorder %s308_s24, %s2167_s19  ;;  %p2176_p2 = scmp.lt.s32.totalorder %s2167_s19, %s2167_s19 }
  0x54   : > { %p2170_p12 = pnand %p2168_p9, %p2496_p13  ;;  %p2177_p4 = por %p2176_p2, %p2175_p1 }
  0x56   : > { %p2171_p0 = pneg %p2170_p12 }
  0x58   : > { %p2178_p8 = pnand %p2177_p4, %p2171_p0 }
  0x5a   : > { %2181 = shalt.err (!%p2178_p8)
}
  0x5b   : > { %2005 = dma.hbm_to_vmem [thread:$0]  (!%p2480_p11), %s2957_s6, 1536, %s308_s24, [#allocation13], %s2363_s25, %s2363_s25, %s2364_s26  }
  0x5c   : > { %s2365_s30 = smov [#allocation11]   ;;  %s2366_s27 = smov [#allocation14]  }
  0x5d   : > { %s291_s16 = sshll.u32 %s2365_s30, 4  ;;  %s320_s28 = sshll.u32 %s2366_s27, 4  ;;  %s292_s16 = int_to_ptr.vmem [resolvable:$true] %s291_s16  ;;  %s321_s28 = int_to_ptr.vmem [resolvable:$true] %s320_s28 }
  0x5e   : > { %s2182_s21 = scalar_lea.hbm %s2955_s4, 512 }
  0x5f   : > { %p2183_p4 = scmp.ne.s32.totalorder %s2955_s4, %s2182_s21  ;;  %p2189_p10 = scmp.lt.u32.totalorder %s2182_s21, %s2955_s4 }
  0x61   : > { %p2185_p8 = pnand %p2183_p4, %p2496_p13 }
  0x63   : > { %p2186_p6 = pneg %p2185_p8 }
  0x65   : > { %p2191_p3 = pnand %p2189_p10, %p2186_p6 }
  0x67   : > { %2194 = shalt.err (!%p2191_p3)
}
  0x68   : > { %s2195_s24 = scalar_lea.vmem %s292_s16, 512  ;;  %p2203_p12 = scmp.lt.s32.totalorder %s292_s16, %s292_s16 }
  0x69   : > { %p2196_p5 = scmp.ne.s32.totalorder %s292_s16, %s2195_s24  ;;  %p2204_p0 = scmp.lt.s32.totalorder %s2195_s24, %s2195_s24 }
  0x6b   : > { %p2198_p7 = pnand %p2196_p5, %p2496_p13  ;;  %p2205_p1 = por %p2204_p0, %p2203_p12 }
  0x6d   : > { %p2199_p9 = pneg %p2198_p7 }
  0x6f   : > { %p2206_p2 = pnand %p2205_p1, %p2199_p9 }
  0x71   : > { %2209 = shalt.err (!%p2206_p2)
}
  0x72   : > { %2002 = dma.hbm_to_vmem [thread:$0]  (!%p2480_p11), %s2955_s4, 512, %s292_s16, [#allocation9], %s2363_s25, %s2363_s25, %s2364_s26  }
  0x73   : > { %s2210_s29 = scalar_lea.hbm %s2958_s7, 1536 }
  0x74   : > { %p2211_p4 = scmp.ne.s32.totalorder %s2958_s7, %s2210_s29  ;;  %p2217_p10 = scmp.lt.u32.totalorder %s2210_s29, %s2958_s7 }
  0x76   : > { %p2213_p8 = pnand %p2211_p4, %p2496_p13 }
  0x78   : > { %p2214_p6 = pneg %p2213_p8 }
  0x7a   : > { %p2219_p3 = pnand %p2217_p10, %p2214_p6 }
  0x7c   : > { %2222 = shalt.err (!%p2219_p3)
}
  0x7d   : > { %s2223_s22 = scalar_lea.vmem %s321_s28, 1536  ;;  %p2231_p12 = scmp.lt.s32.totalorder %s321_s28, %s321_s28 }
  0x7e   : > { %p2224_p5 = scmp.ne.s32.totalorder %s321_s28, %s2223_s22  ;;  %p2232_p0 = scmp.lt.s32.totalorder %s2223_s22, %s2223_s22 }
  0x80   : > { %p2226_p7 = pnand %p2224_p5, %p2496_p13  ;;  %p2233_p1 = por %p2232_p0, %p2231_p12 }
  0x82   : > { %p2227_p9 = pneg %p2226_p7 }
  0x84   : > { %p2234_p2 = pnand %p2233_p1, %p2227_p9 }
  0x86   : > { %2237 = shalt.err (!%p2234_p2)
}
  0x87   : > { %2008 = dma.hbm_to_vmem [thread:$0]  (!%p2480_p11), %s2958_s7, 1536, %s321_s28, [#allocation13], %s2363_s25, %s2363_s25, %s2364_s26  }
  0x88   : > { %s2611_s20 = sadd.s32 1, %s2354_s12   ;;  %s74_s0 = sadd.s32 1, %s2350_s11 }
  0x89   : > { %s71_s14 = ssub.s32 %s2354_s12, %s2611_s20  ;;  %p81_p4 = scmp.ne.s32.totalorder %s2350_s11, %s2346_s10 }
  0x8a   : > { %p72_p13 = scmp.eq.s32.totalorder %s71_s14, 0  ;;  %p82_p8 = scmp.eq.s32.totalorder %s2354_s12, 0 }
  0x8b   : > { %p2022_p6 = scmp.lt.s32.totalorder %s2354_s12, 2  ;;  %p2977_p3 = scmp.eq.s32.totalorder %s2450_s13, 1 }
  0x8c   : > { %s2621_s9 = scalar_select %p72_p13, %s2350_s11, %s74_s0  }
  0x8d   : > { %p83_p10 = por %p82_p8, %p81_p4  ;;  %p2625_p5 = por %p2977_p3, %p81_p4 }
  0x8e   : > { %s337_s27 = sand.u32 1, %s2354_s12   ;;  %s339_s29 = sand.u32 1, %s2350_s11  }
  0x8f   : > { %s1753_s25 = sshll.u32 %s339_s29, 3  ;;  %s1793_s26 = sshll.u32 %s2354_s12, 7 }
  0x90   : > { %s2635_s21 = scalar_lea.hbm %s2953_s2, %s1793_s26  ;;  %s341_s23 = scalar_lea.vmem [#allocation10], %s1753_s25 }
  0x91   : > { %s348_s19 = sshll.u32 %s341_s23, 4  ;;  %p2639_p11 = pnand %p2022_p6, %p83_p10  ;;  %s2637_s19 = int_to_ptr.vmem [resolvable:$true] %s348_s19 }
  0x92   : > { %s2643_s16 = scalar_lea.sflag [#allocation6], %s337_s27  ;;  %s2238_s24 = scalar_lea.hbm %s2635_s21, 128 }
  0x93   : > { %p2239_p7 = scmp.ne.s32.totalorder %s2635_s21, %s2238_s24  ;;  %p2240_p9 = pneg %p2639_p11 }
  0x94   : > { %s2243_s29 = scalar_lea.hbm %s2953_s2, 256  ;;  %p2244_p1 = scmp.lt.u32.totalorder %s2635_s21, %s2953_s2 }
  0x95   : > { %p2241_p12 = pnand %p2240_p9, %p2239_p7  ;;  %p2245_p2 = scmp.lt.u32.totalorder %s2243_s29, %s2238_s24 }
  0x96   : > { %p2247_p4 = scmp.lt.u32.totalorder %s2238_s24, %s2635_s21 }
  0x97   : > { %p2242_p0 = pneg %p2241_p12  ;;  %p2246_p13 = por %p2245_p2, %p2244_p1 }
  0x99   : > { %p2248_p8 = por %p2247_p4, %p2246_p13 }
  0x9b   : > { %p2249_p6 = pnand %p2248_p8, %p2242_p0 }
  0x9d   : > { %2252 = shalt.err (!%p2249_p6)
}
  0x9e   : > { %s2253_s27 = scalar_lea.vmem %s2637_s19, 128  ;;  %s2367_s28 = smov [#allocation10]  }
  0x9f   : > { %p2254_p10 = scmp.ne.s32.totalorder %s2637_s19, %s2253_s27  ;;  %s2258_s18 = sshll.u32 %s2367_s28, 4  ;;  %s2259_s18 = int_to_ptr.vmem [resolvable:$false] %s2258_s18 }
  0xa0   : > { %s2260_s23 = scalar_lea.vmem %s2259_s18, 256  ;;  %p2261_p12 = scmp.lt.s32.totalorder %s2637_s19, %s2259_s18 }
  0xa1   : > { %p2256_p3 = pnand %p2254_p10, %p2240_p9  ;;  %p2262_p1 = scmp.lt.s32.totalorder %s2260_s23, %s2253_s27 }
  0xa3   : > { %p2257_p7 = pneg %p2256_p3  ;;  %p2263_p2 = por %p2262_p1, %p2261_p12 }
  0xa5   : > { %p2264_p13 = pnand %p2263_p2, %p2257_p7 }
  0xa7   : > { %2267 = shalt.err (!%p2264_p13)
}
  0xa8   : > { %s2368_s24 = smov 32   ;;  %s2369_s14 = smov 2  }
  0xa9   : > { %2012 = dma.hbm_to_vmem [thread:$0]  (!%p2639_p11), %s2635_s21, 128, %s2637_s19, %s2643_s16, %s2368_s24, %s2368_s24, %s2369_s14  }
  0xaa   : > { %p2980_p9 = scmp.ne.s32.totalorder %s2973_s17, 0 }
  0xab   : > { %p2981_p0 = scmp.eq.s32.totalorder (!%p2980_p9), %s2450_s13, 0 }
  0xac   : > { %360 = sbr.rel (%p2980_p9) target bundleno = 1828 (0x724), region = 56 }
  0xb3   : > { %2317 = dma.done.wait (%p2981_p0), [#allocation6], 256   ;;  %p2982_p4 = pmov %p2981_p0 }
  0xb4   : > { %p2983_p8 = pmov %p2981_p0 }
  0xb5   : > { %2319 = vsyncadd (%p2982_p4), [#allocation6], 4294967040 }
  0xb6   : > { %2321 = dma.done.wait (%p2983_p8), [#allocation9], 256   ;;  %p2984_p6 = pmov %p2981_p0 }
  0xb7   : > { %s370_s22 = sand.u32 1, %s2450_s13   ;;  %s2683_s21 = sand.u32 1, %s2346_s10  }
  0xb8   : > { %2323 = vsyncadd (%p2984_p6), [#allocation9], 4294967040  ;;  %s1759_s17 = sshll.u32 %s2683_s21, 3  ;;  %s371_s19 = scalar_lea.sflag [#allocation6], %s370_s22 }
  0xb9   : > { %s2686_s16 = scalar_lea.vmem [#allocation10], %s1759_s17  ;;  %p2985_p11 = scmp.ne.s32.totalorder %s2970_s15, 0 }
  0xbb   : > { %2325 = dma.done.wait (%p2985_p11), %s371_s19, 128  }
  0xbc   : > { %2327 = vsyncadd (%p2985_p11), %s371_s19, 4294967168  ;;  %p2986_p10 = pmov %p2981_p0 }
  0xbd   : > { %p2987_p3 = pmov %p2981_p0 }
  0xbe   : > { %2329 = dma.done.wait (%p2986_p10), [#allocation9], 512  }
  0xbf   : > { %2331 = vsyncadd (%p2987_p3), [#allocation9], 4294966784  ;;  %p2988_p7 = pmov %p2981_p0 }
  0xc0   : > { %p2989_p12 = pmov %p2981_p0 }
  0xc1   : > { %2333 = dma.done.wait (%p2988_p7), [#allocation13], 3072  }
  0xc2   : > { %2335 = vsyncadd (%p2989_p12), [#allocation13], 4294964224  ;;  %s1967_s0 = smul.u32 24, %s2683_s21  ;;  %v2370_v0 = vmov 0.0|0.0   ;;  %vm2371_vm0 = vmmov 0   ;;  %v2372_v1 = vmov 0.0   ;;  %v440_v2 = vlaneseq }
  0xc3   : > { %1920 = vmatprep.subr.bf16.mxu0 %v2370_v0  ;;  %1841 = vmatprep.mubr.msk.f32.mxu0 %vm2371_vm0, %v2372_v1  ;;  %v2373_v3 = vmov 1983009808   ;;  %v2707_v7 = vld [vmem:[#allocation8] sm:$0xff]  ;;  %v2709_v8 = vld [vmem:[#allocation8 + $0x8] sm:$0xff]  ;;  %v2714_v9 = vld [vmem:[%s2954_s3] sm:$0x3] }
  0xc4   : > { %v438_v4 = vunpack.c.l.s4 %v2373_v3  ;;  %v2705_v6 = vshrl.u32 %v440_v2, 7  ;;  %v2719_v10 = vld [vmem:[%s2956_s5] ss:$0 sm:$0xff]  ;;  %v427_v11 = vld [vmem:[#allocation11] sm:$0xff]  ;;  %v428_v12 = vld [vmem:[#allocation11 + $0x8] sm:$0xff]  ;;  %vm452_vm1 = vcmask 261120  }
  0xc5   : > { %v1921_v13 = vpack.c.bf16 %v428_v12, %v427_v11  ;;  %v429_v14 = vld [vmem:[#allocation11 + $0x10] sm:$0xff]  ;;  %v430_v15 = vld [vmem:[#allocation11 + $0x18] sm:$0xff]  ;;  %vm547_vm2 = vcmask 254976   ;;  %s2740_s27 = scalar_lea.vmem [#allocation15], %s1967_s0  ;;  %s2742_s28 = smov 0  }
  0xc6   : > { %v439_v5 = vunpack.c.0.s8 %v438_v4  ;;  %v423_v16 = vld [vmem:[%s2686_s16] sm:$0x3]  ;;  %v424_v18 = vld [vmem:[%s2686_s16 + $0x2] sm:$0x3]  ;;  %v425_v19 = vld [vmem:[%s2686_s16 + $0x4] sm:$0x3]  ;;  %v1924_v21 = vpack.c.bf16 %v430_v15, %v429_v14 }
  0xc7   : > { %v426_v20 = vld [vmem:[%s2686_s16 + $0x6] sm:$0x3]  ;;  %1922 = vmatpush3.bf16.msra.mxu0 %v1921_v13  ;;  %v435_v22 = vcombine.low %v423_v16, %v424_v18 }
  0xc8   : > { %v2723_v17 = vsub.s32 %v439_v5, %v2705_v6  ;;  %v436_v23 = vcombine.low %v425_v19, %v426_v20  ;;  %1923 = vmatprep.subr.bf16.mxu0 %v2370_v0 }
  0xca   : > { %v443_v24 = vrot.slane %v435_v22, %v2723_v17  ;;  %v450_v25 = vrot.slane %v436_v23, %v2723_v17 }
  0xcb   : > { %1925 = vmatpush3.bf16.msra.mxu0 %v1924_v21 }
  0xcc   : > { %v451_v26 = vcombine.low %v443_v24, %v450_v25 }
  0xce   : > { %1842 = vmatmul.mubr.msk.f32.vlgmr.msra.gmra.mrb[0].mxu0 %vm452_vm1, %v451_v26 }
 0x1a1   : > { %v521_v27 = vpop.f32.mrb[0].mxu0 }
 0x1a2   : > { %v526_v28 = vcombine.high %v521_v27, %v521_v27  ;;  %v533_v29 = vrot.slane %v521_v27, %v2723_v17  ;;  %v1843_v30 = vpop.f32.mrb[1].mxu0 }
 0x1a4   : > { %v540_v31 = vrot.slane %v526_v28, %v2723_v17  ;;  %v541_v32 = vcombine.high %v533_v29, %v533_v29  ;;  %548 = vst.msk [vmem:[#allocation2] sm:$0x3] %vm547_vm2, %v533_v29 }
 0x1a6   : > { %v542_v33 = vcombine.high %v540_v31, %v540_v31  ;;  %549 = vst.msk [vmem:[#allocation2 + $0x2] sm:$0x3] %vm547_vm2, %v541_v32  ;;  %550 = vst.msk [vmem:[#allocation2 + $0x4] sm:$0x3] %vm547_vm2, %v540_v31 }
 0x1a8   : > { %551 = vst.msk [vmem:[#allocation2 + $0x6] sm:$0x3] %vm547_vm2, %v542_v33 }
 0x1a9 LB: >> { %v2748_v34 = vsub.s32 0, %v2705_v6  ;;  %v2751_v35 = vsub.s32 1, %v2705_v6  ;;  %v2374_v36 = vmov 1966171168   ;;  %s1764_s18 = sshll.u32 %s2358_s28, 1  ;;  %v2375_v56 = vmov 0   ;;  %s2358_s28 = sphi %s2742_s28, %s561_s28  }
 0x1aa   : >> { %v575_v37 = vunpack.c.l.s4 %v2374_v36  ;;  %s563_s23 = scalar_lea.vmem [#allocation2], %s1764_s18  ;;  %2086 = vset.pattern.permute.xlu0 %v2375_v56  ;;  %2087 = vset.pattern.permute.xlu1 %v2375_v56  ;;  %v644_v63 = vand.u32 127, %v440_v2  ;;  %vm653_vm3 = vcmask 1041409   ;;  %vm656_vm4 = vcmask 58368   ;;  %s736_s24 = scalar_lea.vmem [#allocation3], %s1764_s18 }
 0x1ab   : >> { %v620_v38 = vrot.slane %v2714_v9, %v2748_v34  ;;  %v627_v41 = vrot.slane %v2714_v9, %v2751_v35  ;;  %s561_s28 = sadd.s32 1, %s2358_s28  }
 0x1ac   : >> { %v576_v39 = vunpack.c.0.s8 %v575_v37  ;;  %v647_v3 = vsub.s32 %v644_v63, %v2705_v6  ;;  %p558_p1 = scmp.ge.s32.totalorder %s561_s28, 4  }
 0x1ad   : >> { %622 = vbcast.lane.b32.xlu1 %v620_v38, 256  ;;  %1844 = vmatprep.subr.mxu1 (%p558_p1), %v2372_v1  ;;  %vm751_vm5 = vcmask (%p558_p1), 1042434   ;;  %vm754_vm6 = vcmask (%p558_p1), 1043459   ;;  %vm756_vm7 = vcmask (%p558_p1), 64512   ;;  %vm858_vm8 = vcmask (%p558_p1), 253952   ;;  %s1968_s15 = smul.u32 (%p558_p1), 384, %s2450_s13 }
 0x1ae   : >> { %v2761_v42 = vsub.s32 %v576_v39, %v2705_v6  ;;  %1846 = vmatprep.mubr.msk.f32.mxu1 (%p558_p1), %vm2371_vm0, %v2372_v1  ;;  %1926 = vmatprep.subr.bf16.mxu0 (%p558_p1), %v2370_v0  ;;  %s1616_s29 = sshll.u32 (%p558_p1), %s2740_s27, 4  ;;  %s2990_s28 = sld [smem:[#allocation25_spill]] (%p558_p1)  ;;  %s2901_s29 = int_to_ptr.vmem [resolvable:$true] %s1616_s29 }
 0x1af   : >> { %v1765_v40 = vld.sshfl [vmem:[%s563_s23] sm:$0x11 pattern:$0x75316420]  ;;  %1862 = vmatprep.mubr.msk.f32.mxu0 (%p558_p1), %vm2371_vm0, %v2372_v1  ;;  %s1602_s13 = scalar_lea.sflag (%p558_p1), [#allocation7], %s2683_s21  ;;  %s2268_s23 = scalar_lea.vmem (%p558_p1), %s2901_s29, 384 }
 0x1b0   : >> { %v573_v43 = vcombine.high %v1765_v40, %v1765_v40  ;;  %v580_v44 = vrot.slane %v1765_v40, %v2761_v42  ;;  %p2269_p2 = scmp.ne.s32.totalorder (%p558_p1), %s2901_s29, %s2268_s23 }
 0x1b1   : >> { %629 = vbcast.lane.b32.xlu1 %v627_v41, 256 }
 0x1b2   : >> { %v587_v45 = vrot.slane %v573_v43, %v2761_v42  ;;  %v591_v46 = vrot.slane %v580_v44, %v2748_v34  ;;  %p2270_p13 = pnand (%p558_p1), %p2269_p2, %p2625_p5 }
 0x1b4   : >> { %v595_v47 = vrot.slane %v587_v45, %v2748_v34  ;;  %v598_v48 = vadd.f32 %v591_v46, %v2707_v7  ;;  %s2899_s18 = scalar_lea.hbm (%p558_p1), %s2990_s28, %s1968_s15  ;;  %p2271_p9 = pneg (%p558_p1), %p2270_p13 }
 0x1b6   : >> { %v599_v49 = vadd.f32 %v595_v47, %v2709_v8  ;;  %2088 = vtanh.f32 %v598_v48 }
 0x1b8   : >> { %2090 = vtanh.f32 %v599_v49 }
 0x1c0   : >> { %v2089_v50 = vpop.eup %2088 }
 0x1c1   : >> { %v608_v52 = vmul.f32 %v2089_v50, %v2719_v10 }
 0x1c2   : >> { %v2091_v51 = vpop.eup %2090 }
 0x1c3   : >> { %v609_v53 = vmul.f32 %v2091_v51, %v2719_v10  ;;  %v610_v54 = vsel %vm452_vm1, %v608_v52, 0.0 }
 0x1c4   : >> { %611 = vadd.xlane.f32.xlu0 %v610_v54 }
 0x1c5   : >> { %v613_v55 = vsel %vm452_vm1, %v609_v53, 0.0 }
 0x1c8   : >> { %614 = vadd.xlane.f32.xlu0 %v613_v55 }
 0x21f   : >> { %v623_v57 = vpop.permute.xlu1 %622 }
 0x223   : >> { %v630_v60 = vpop.permute.xlu1 %629 }
 0x251   : >> { %v612_v58 = vpop.xlane.xlu0 %611 }
 0x252   : >> { %v633_v59 = vmul.f32 %v623_v57, %v612_v58 }
 0x254   : >> { %638 = vperm.xlu0 %2086, %v633_v59  }
 0x255   : >> { %v615_v61 = vpop.xlane.xlu0 %614 }
 0x256   : >> { %v634_v62 = vmul.f32 %v630_v60, %v615_v61 }
 0x258   : >> { %641 = vperm.xlu1 %2087, %v634_v62  }
 0x2d3   : >> { %v639_v4 = vpop.permute.xlu0 %638 }
 0x2d4   : >> { %v648_v11 = vrot.slane %v639_v4, %v647_v3  ;;  %v992_v4 = vld [vmem:[#allocation12] sm:$0xff] (%p558_p1) }
 0x2d7   : >> { %v642_v5 = vpop.permute.xlu1 %641 }
 0x2d8   : >> { %v652_v12 = vrot.slane %v642_v5, %v647_v3  ;;  %v993_v5 = vld [vmem:[#allocation12 + $0x8] sm:$0xff] (%p558_p1) }
 0x2da   : >> { %v654_v13 = vsel %vm653_vm3, %v652_v12, %v648_v11  ;;  %v1933_v11 = vpack.c.bf16 (%p558_p1), %v993_v5, %v992_v4  ;;  %v994_v12 = vld [vmem:[#allocation12 + $0x10] sm:$0xff] (%p558_p1)  ;;  %v1416_v4 = vld [vmem:[#allocation12 + $0x58] sm:$0xff] (%p558_p1) }
 0x2db   : >> { %v657_v14 = vsel %vm656_vm4, %v654_v13, -inf  ;;  %v995_v13 = vld [vmem:[#allocation12 + $0x18] sm:$0xff] (%p558_p1) }
 0x2dc   : >> { %658 = vmax.xlane.f32.xlu1 %v657_v14  ;;  %v996_v14 = vld [vmem:[#allocation14] sm:$0xff] (%p558_p1) }
 0x369   : >> { %v659_v15 = vpop.xlane.xlu1 %658 }
 0x36a   : >> { %v664_v16 = vrot.slane %v659_v15, %v2748_v34  ;;  %v668_v18 = vrot.slane %v659_v15, %v2751_v35  ;;  %v1936_v15 = vpack.c.bf16 (%p558_p1), %v995_v13, %v994_v12  ;;  %v1224_v12 = vld [vmem:[#allocation12 + $0x20] sm:$0xff] (%p558_p1)  ;;  %v1225_v13 = vld [vmem:[#allocation12 + $0x28] sm:$0xff] (%p558_p1) }
 0x36c   : >> { %v671_v19 = vsub.f32 %v633_v59, %v664_v16  ;;  %v672_v20 = vsub.f32 %v634_v62, %v668_v18  ;;  %v997_v16 = vld [vmem:[#allocation14 + $0x8] sm:$0xff] (%p558_p1)  ;;  %v984_v18 = vld [vmem:[%s2686_s16] sm:$0x3] (%p558_p1) }
 0x36e   : >> { %v673_v21 = vmul.f32 1.442695, %v671_v19  ;;  %v675_v22 = vmul.f32 1.442695, %v672_v20  ;;  %v985_v19 = vld [vmem:[%s2686_s16 + $0x2] sm:$0x3] (%p558_p1)  ;;  %v1927_v20 = vpack.c.bf16 (%p558_p1), %v997_v16, %v996_v14  ;;  %v1945_v14 = vpack.c.bf16 (%p558_p1), %v1225_v13, %v1224_v12 }
 0x36f   : > { %v1227_v16 = vld [vmem:[#allocation12 + $0x38] sm:$0xff] (%p558_p1) }
 0x370   : >> { %2092 = vpow2.f32 %v673_v21  ;;  %v986_v21 = vld [vmem:[%s2686_s16 + $0x4] sm:$0x3] (%p558_p1)  ;;  %1928 = vmatpush3.bf16.msra.mxu0 (%p558_p1), %v1927_v20 }
 0x371   : >> { %2094 = vpow2.f32 %v675_v22  ;;  %v987_v22 = vld [vmem:[%s2686_s16 + $0x6] sm:$0x3] (%p558_p1)  ;;  %1929 = vmatprep.subr.bf16.mxu0 (%p558_p1), %v2370_v0 }
 0x37a   : >> { %v2093_v23 = vpop.eup %2092 }
 0x37b   : >> { %v2095_v24 = vpop.eup %2094  ;;  %v677_v25 = vmul.f32 %v2093_v23, %v623_v57  ;;  %v868_v57 = vld [vmem:[#allocation5 + $0x8] sm:$0xff] (%p558_p1)  ;;  %v1097_v23 = vcombine.low (%p558_p1), %v984_v18, %v985_v19 }
 0x37c   : >> { %v678_v26 = vmul.f32 %v2095_v24, %v630_v60  ;;  %v1418_v24 = vld [vmem:[#allocation14 + $0x40] sm:$0xff] (%p558_p1) }
 0x37d   : >> { %682 = vperm.xlu1 %2087, %v677_v25  }
 0x37e   : >> { %685 = vperm.xlu0 %2086, %v678_v26  }
 0x3fc   : >> { %v683_v27 = vpop.permute.xlu1 %682 }
 0x3fd   : >> { %v686_v28 = vpop.permute.xlu0 %685  ;;  %v690_v29 = vrot.slane %v683_v27, %v647_v3  ;;  %v998_v27 = vld [vmem:[#allocation14 + $0x10] sm:$0xff] (%p558_p1) }
 0x3fe   : >> { %v694_v30 = vrot.slane %v686_v28, %v647_v3  ;;  %v999_v28 = vld [vmem:[#allocation14 + $0x18] sm:$0xff] (%p558_p1) }
 0x400   : >> { %v695_v31 = vsel %vm653_vm3, %v694_v30, %v690_v29  ;;  %v1105_v29 = vrot.slane (%p558_p1), %v1097_v23, %v2723_v17  ;;  %v1930_v30 = vpack.c.bf16 (%p558_p1), %v999_v28, %v998_v27 }
 0x401   : >> { %v697_v32 = vsel %vm656_vm4, %v695_v31, 0.0 }
 0x402   : >> { %698 = vadd.xlane.f32.xlu0 %v697_v32  ;;  %1931 = vmatpush3.bf16.msra.mxu0 (%p558_p1), %v1930_v30 }
 0x403   : > { %1938 = vmatprep.subr.bf16.mxu0 (%p558_p1), %v2370_v0 }
 0x48f   : >> { %v699_v33 = vpop.xlane.xlu0 %698 }
 0x490   : >> { %v700_v36 = vadd.f32 1e-06, %v699_v33 }
 0x492   : >> { %2096 = vrcp.f32 %v700_v36 }
 0x49c   : >> { %v2097_v37 = vpop.eup %2096 }
 0x49d   : >> { %v702_v38 = vmul.f32 %v2097_v37, %v700_v36  ;;  %v1420_v36 = vld [vmem:[#allocation14 + $0x50] sm:$0xff] (%p558_p1) }
 0x49f   : >> { %v703_v39 = vsub.f32 2.0, %v702_v38 }
 0x4a1   : >> { %v704_v40 = vmul.f32 %v2097_v37, %v703_v39  ;;  %v1421_v37 = vld [vmem:[#allocation14 + $0x58] sm:$0xff] (%p558_p1) }
 0x4a2   : > { %v1954_v38 = vpack.c.bf16 (%p558_p1), %v1421_v37, %v1420_v36 }
 0x4a3   : >> { %v709_v41 = vrot.slane %v704_v40, %v2748_v34  ;;  %v713_v44 = vrot.slane %v704_v40, %v2751_v35  ;;  %v742_v34 = vld [vmem:[#allocation5] sm:$0xff] (%p558_p1) }
 0x4a4   : > { %1845 = vmatpush3.msra.mxu1 (%p558_p1), %v742_v34 }
 0x4a5   : >> { %v716_v43 = vmul.f32 %v709_v41, %v677_v25  ;;  %v717_v45 = vmul.f32 %v713_v44, %v678_v26  ;;  %1849 = vmatprep.subr.mxu1 (%p558_p1), %v2372_v1  ;;  %v1098_v25 = vcombine.low (%p558_p1), %v986_v21, %v987_v22  ;;  %v1419_v26 = vld [vmem:[#allocation14 + $0x48] sm:$0xff] (%p558_p1) }
 0x4a6   : > { %v1951_v32 = vpack.c.bf16 (%p558_p1), %v1419_v26, %v1418_v24  ;;  %v1771_v24 = vld [vmem:[%s2959_s8] ss:$0 sm:$0xff] (%p558_p1) }
 0x4a7   : >> { %721 = vperm.xlu1 %2087, %v716_v43   ;;  %v1112_v31 = vrot.slane (%p558_p1), %v1098_v25, %v2723_v17 }
 0x4a9   : > { %v2819_v33 = vcombine.low (%p558_p1), %v1105_v29, %v1112_v31 }
 0x4ab   : >> { %724 = vperm.xlu1 %2087, %v717_v45  }
 0x526   : >> { %v722_v46 = vpop.permute.xlu1 %721 }
 0x527   : >> { %v729_v48 = vrot.slane %v722_v46, %v647_v3 }
 0x528   : > { %560 = sbr.rel (!%p558_p1) target bundleno = 425 (0x1a9), region = 138 }
 0x52a   : >> { %v725_v47 = vpop.permute.xlu1 %724 }
 0x52b   : >> { %v733_v49 = vrot.slane %v725_v47, %v647_v3 }
 0x52d   : >> { %v734_v50 = vsel %vm653_vm3, %v733_v49, %v729_v48 }
 0x52e   : >> { %737 = vst.msk [vmem:[%s736_s24] sm:$0x3] %vm656_vm4, %v734_v50  ;;  %s2376_s24 = smov (%p558_p1), [#allocation15]  }
 0x52f   : > { %s2272_s14 = sshll.u32 %s2376_s24, 4  ;;  %s2273_s14 = int_to_ptr.vmem [resolvable:$false] %s2272_s14 }
 0x530   : > { %s2274_s22 = scalar_lea.vmem %s2273_s14, 768  ;;  %p2275_p0 = scmp.lt.s32.totalorder %s2901_s29, %s2273_s14 }
 0x531   : > { %p2276_p4 = scmp.lt.s32.totalorder %s2274_s22, %s2268_s23 }
 0x533   : > { %p2277_p8 = por %p2276_p4, %p2275_p0 }
 0x535   : > { %v738_v35 = vld [vmem:[#allocation3] sm:$0x1]  ;;  %v739_v51 = vld [vmem:[#allocation3 + $0x2] sm:$0x1]  ;;  %v740_v52 = vld [vmem:[#allocation3 + $0x4] sm:$0x1]  ;;  %p2278_p6 = pnand %p2277_p8, %p2271_p9 }
 0x536   : > { %v741_v53 = vld [vmem:[#allocation3 + $0x6] sm:$0x1]  ;;  %v747_v54 = vrot.slane %v739_v51, 7  ;;  %v750_v55 = vrot.slane %v740_v52, 6  ;;  %v863_v2 = vld [vmem:[#allocation3 + $0x1] sm:$0x1] }
 0x537   : > { %v753_v56 = vrot.slane %v741_v53, 5  ;;  %v864_v7 = vld [vmem:[#allocation3 + $0x3] sm:$0x1]  ;;  %v865_v8 = vld [vmem:[#allocation3 + $0x5] sm:$0x1] }
 0x538   : > { %v749_v6 = vsel %vm653_vm3, %v747_v54, %v738_v35  ;;  %v866_v9 = vld [vmem:[#allocation3 + $0x7] sm:$0x1]  ;;  %v873_v58 = vrot.slane %v864_v7, 7  ;;  %v875_v59 = vrot.slane %v865_v8, 6 }
 0x539   : > { %v752_v10 = vsel %vm751_vm5, %v750_v55, %v749_v6  ;;  %v877_v60 = vrot.slane %v866_v9, 5  ;;  %v1229_v7 = vld [vmem:[#allocation14 + $0x20] sm:$0xff]  ;;  %v1230_v9 = vld [vmem:[#allocation14 + $0x28] sm:$0xff] }
 0x53a   : > { %v755_v61 = vsel %vm754_vm6, %v753_v56, %v752_v10  ;;  %v874_v62 = vsel %vm653_vm3, %v873_v58, %v863_v2  ;;  %v1413_v10 = vld [vmem:[#allocation12 + $0x40] sm:$0xff] }
 0x53b   : > { %1847 = vmatmul.mubr.msk.f32.vlgmr.msra.gmra.mrb[0].mxu1 %vm756_vm7, %v755_v61  ;;  %v876_v63 = vsel %vm751_vm5, %v875_v59, %v874_v62  ;;  %v1939_v59 = vpack.c.bf16 %v1230_v9, %v1229_v7  ;;  %v1231_v61 = vld [vmem:[#allocation14 + $0x30] sm:$0xff] }
 0x53c   : > { %1850 = vmatpush3.msra.mxu1 %v868_v57  ;;  %1851 = vmatprep.mubr.msk.f32.mxu1 %vm2371_vm0, %v2372_v1  ;;  %v878_v3 = vsel %vm754_vm6, %v877_v60, %v876_v63  ;;  %v1232_v63 = vld [vmem:[#allocation14 + $0x38] sm:$0xff] }
 0x53d   : > { %1932 = vmatprep.subr.bf16.mxu1 %v2370_v0  ;;  %v1942_v5 = vpack.c.bf16 %v1232_v63, %v1231_v61 }
 0x53f   : > { %1852 = vmatmul.mubr.msk.f32.vlgmr.msra.gmra.mrb[2].mxu1 %vm756_vm7, %v878_v3  ;;  %v1415_v3 = vld [vmem:[#allocation12 + $0x50] sm:$0xff] }
 0x540   : > { %1873 = vmatprep.mubr.msk.f32.mxu1 %vm2371_vm0, %v2372_v1  ;;  %1934 = vmatpush3.bf16.msra.mxu1 %v1933_v11  ;;  %v1960_v11 = vpack.c.bf16 %v1416_v4, %v1415_v3 }
 0x541   : > { %1935 = vmatprep.subr.bf16.mxu1 %v2370_v0 }
 0x544   : > { %1937 = vmatpush3.bf16.msra.mxu1 %v1936_v15  ;;  %v1226_v15 = vld [vmem:[#allocation12 + $0x30] sm:$0xff] }
 0x545   : > { %1950 = vmatprep.subr.bf16.mxu1 %v2370_v0  ;;  %v1948_v18 = vpack.c.bf16 %v1227_v16, %v1226_v15 }
 0x547   : > { %1874 = vmatmul.mubr.msk.f32.vlgmr.msra.gmra.mrb[4].mxu1 %vm452_vm1, %v2819_v33 }
 0x548   : > { %1952 = vmatpush3.bf16.msra.mxu1 %v1951_v32  ;;  %1906 = vmatprep.mubr.msk.f32.mxu1 %vm2371_vm0, %v2372_v1  ;;  %v1783_v32 = vld [vmem:[%s2959_s8 + $0x2] ss:$0 sm:$0xff] }
 0x549   : > { %1953 = vmatprep.subr.bf16.mxu1 %v2370_v0 }
 0x54c   : > { %1955 = vmatpush3.bf16.msra.mxu1 %v1954_v38 }
 0x54d   : > { %1956 = vmatprep.subr.bf16.mxu1 %v2370_v0 }
 0x60e   : > { %v825_v39 = vpop.f32.mrb[0].mxu1 }
 0x60f   : > { %v836_v40 = vrot.slane %v825_v39, %v2761_v42  ;;  %v1848_v41 = vpop.f32.mrb[1].mxu1 }
 0x611   : > { %v837_v43 = vcombine.high %v836_v40, %v836_v40  ;;  %v844_v44 = vrot.slane %v836_v40, %v2761_v42 }
 0x612   : > { %v947_v45 = vpop.f32.mrb[2].mxu1 }
 0x613   : > { %v851_v46 = vrot.slane %v837_v43, %v2761_v42  ;;  %v852_v47 = vcombine.high %v844_v44, %v844_v44  ;;  %859 = vst.msk [vmem:[#allocation4] sm:$0x1] %vm858_vm8, %v844_v44  ;;  %v958_v48 = vrot.slane %v947_v45, %v2761_v42  ;;  %v1853_v49 = vpop.f32.mrb[3].mxu1 }
 0x615   : > { %v853_v50 = vcombine.high %v851_v46, %v851_v46  ;;  %860 = vst.msk [vmem:[#allocation4 + $0x2] sm:$0x1] %vm858_vm8, %v851_v46  ;;  %861 = vst.msk [vmem:[#allocation4 + $0x4] sm:$0x1] %vm858_vm8, %v852_v47  ;;  %v959_v34 = vcombine.high %v958_v48, %v958_v48  ;;  %v966_v35 = vrot.slane %v958_v48, %v2761_v42  ;;  %v1775_v48 = vld [vmem:[%s2959_s8 + $0x1] ss:$0 sm:$0xff] }
 0x617   : > { %862 = vst.msk [vmem:[#allocation4 + $0x6] sm:$0x1] %vm858_vm8, %v853_v50  ;;  %v973_v51 = vrot.slane %v959_v34, %v2761_v42  ;;  %v974_v52 = vcombine.high %v966_v35, %v966_v35  ;;  %980 = vst.msk [vmem:[#allocation4 + $0x1] sm:$0x1] %vm858_vm8, %v966_v35  ;;  %v1414_v42 = vld [vmem:[#allocation12 + $0x48] sm:$0xff] }
 0x618   : > { %v1957_v60 = vpack.c.bf16 %v1414_v42, %v1413_v10 }
 0x619   : > { %v975_v53 = vcombine.high %v973_v51, %v973_v51  ;;  %981 = vst.msk [vmem:[#allocation4 + $0x3] sm:$0x1] %vm858_vm8, %v973_v51  ;;  %982 = vst.msk [vmem:[#allocation4 + $0x5] sm:$0x1] %vm858_vm8, %v974_v52 }
 0x61a   : > { %v1182_v19 = vpop.f32.mrb[4].mxu1 }
 0x61b   : > { %983 = vst.msk [vmem:[#allocation4 + $0x7] sm:$0x1] %vm858_vm8, %v975_v53  ;;  %v1875_v20 = vpop.f32.mrb[5].mxu1 }
 0x61e   : > { %v988_v54 = vld [vmem:[#allocation4] sm:$0x3] }
 0x620   : > { %v989_v55 = vld [vmem:[#allocation4 + $0x2] sm:$0x3]  ;;  %v990_v2 = vld [vmem:[#allocation4 + $0x4] sm:$0x3] }
 0x621   : > { %v1004_v56 = vcombine.low %v988_v54, %v989_v55 }
 0x622   : > { %v991_v6 = vld [vmem:[#allocation4 + $0x6] sm:$0x3] }
 0x623   : > { %v1005_v8 = vcombine.low %v990_v2, %v991_v6  ;;  %v1012_v57 = vrot.slane %v1004_v56, %v2723_v17 }
 0x625   : > { %v1019_v58 = vrot.slane %v1005_v8, %v2723_v17 }
 0x627   : > { %v1020_v62 = vcombine.low %v1012_v57, %v1019_v58 }
 0x629   : > { %1863 = vmatmul.mubr.msk.f32.vlgmr.msra.gmra.mrb[2].mxu0 %vm452_vm1, %v1020_v62  ;;  %1907 = vmatmul.mubr.msk.f32.vlgmr.msra.gmra.mrb[6].mxu1 %vm452_vm1, %v1020_v62 }
 0x62a   : > { %1940 = vmatpush3.bf16.msra.mxu0 %v1939_v59  ;;  %1958 = vmatpush3.bf16.msra.mxu1 %v1957_v60 }
 0x62b   : > { %1941 = vmatprep.subr.bf16.mxu0 %v2370_v0  ;;  %1959 = vmatprep.subr.bf16.mxu1 %v2370_v0 }
 0x62c   : > { %1884 = vmatprep.mubr.msk.f32.mxu0 %vm2371_vm0, %v2372_v1  ;;  %1917 = vmatprep.mubr.msk.f32.mxu1 %vm2371_vm0, %v2372_v1 }
 0x62e   : > { %1943 = vmatpush3.bf16.msra.mxu0 %v1942_v5  ;;  %1961 = vmatpush3.bf16.msra.mxu1 %v1960_v11 }
 0x62f   : > { %1944 = vmatprep.subr.bf16.mxu0 %v2370_v0 }
 0x631   : > { %1885 = vmatmul.mubr.msk.f32.vlgmr.msra.gmra.mrb[4].mxu0 %vm452_vm1, %v1020_v62  ;;  %1918 = vmatmul.mubr.msk.f32.vlgmr.msra.gmra.mrb[6].mxu1 %vm452_vm1, %v2819_v33 }
 0x632   : > { %1946 = vmatpush3.bf16.msra.mxu0 %v1945_v14  ;;  %1895 = vmatprep.mubr.msk.f32.mxu0 %vm2371_vm0, %v2372_v1 }
 0x633   : > { %1947 = vmatprep.subr.bf16.mxu0 %v2370_v0 }
 0x636   : > { %1949 = vmatpush3.bf16.msra.mxu0 %v1948_v18 }
 0x639   : > { %1896 = vmatmul.mubr.msk.f32.vlgmr.msra.gmra.mrb[4].mxu0 %vm452_vm1, %v2819_v33 }
 0x6fc   : > { %v1089_v21 = vpop.f32.mrb[2].mxu0 }
 0x6fd   : > { %v1183_v22 = vadd.f32 %v1182_v19, %v1089_v21  ;;  %v1864_v23 = vpop.f32.mrb[3].mxu0 }
 0x6ff   : > { %v1187_v25 = vcombine.high %v1183_v22, %v1183_v22  ;;  %v1194_v1 = vrot.slane %v1183_v22, %v2723_v17 }
 0x701   : > { %v1201_v0 = vrot.slane %v1187_v25, %v2723_v17  ;;  %v1202_v26 = vcombine.high %v1194_v1, %v1194_v1  ;;  %v1215_v27 = vadd.f32 %v1771_v24, %v1194_v1 }
 0x703   : > { %v1203_v28 = vcombine.high %v1201_v0, %v1201_v0  ;;  %v1216_v29 = vadd.f32 %v1771_v24, %v1202_v26  ;;  %v1217_v30 = vadd.f32 %v1771_v24, %v1201_v0  ;;  %1219 = vst.msk [vmem:[%s2740_s27] sm:$0x3] %vm547_vm2, %v1215_v27 }
 0x704   : > { %v1558_v31 = vpop.f32.mrb[6].mxu1 }
 0x705   : > { %v1218_v33 = vadd.f32 %v1771_v24, %v1203_v28  ;;  %1220 = vst.msk [vmem:[%s2740_s27 + $0x6] sm:$0x3] %vm547_vm2, %v1216_v29  ;;  %1221 = vst.msk [vmem:[%s2740_s27 + $0xc] sm:$0x3] %vm547_vm2, %v1217_v30  ;;  %v1563_v36 = vcombine.high %v1558_v31, %v1558_v31  ;;  %v1570_v37 = vrot.slane %v1558_v31, %v2723_v17  ;;  %v1919_v38 = vpop.f32.mrb[7].mxu1 }
 0x707   : > { %1222 = vst.msk [vmem:[%s2740_s27 + $0x12] sm:$0x3] %vm547_vm2, %v1218_v33  ;;  %v1577_v39 = vrot.slane %v1563_v36, %v2723_v17  ;;  %v1578_v40 = vcombine.high %v1570_v37, %v1570_v37  ;;  %v1592_v41 = vadd.f32 %v1783_v32, %v1570_v37 }
 0x709   : > { %v1579_v43 = vcombine.high %v1577_v39, %v1577_v39  ;;  %v1593_v44 = vadd.f32 %v1783_v32, %v1578_v40  ;;  %v1594_v45 = vadd.f32 %v1783_v32, %v1577_v39  ;;  %1784 = vst.msk [vmem:[%s2740_s27 + $0x4] sm:$0x3] %vm547_vm2, %v1592_v41 }
 0x70b   : > { %v1595_v46 = vadd.f32 %v1783_v32, %v1579_v43  ;;  %1785 = vst.msk [vmem:[%s2740_s27 + $0xa] sm:$0x3] %vm547_vm2, %v1593_v44  ;;  %1786 = vst.msk [vmem:[%s2740_s27 + $0x10] sm:$0x3] %vm547_vm2, %v1594_v45 }
 0x70c   : > { %v1369_v47 = vpop.f32.mrb[4].mxu0 }
 0x70d   : > { %1787 = vst.msk [vmem:[%s2740_s27 + $0x16] sm:$0x3] %vm547_vm2, %v1595_v46  ;;  %v1374_v49 = vcombine.high %v1369_v47, %v1369_v47  ;;  %v1381_v50 = vrot.slane %v1369_v47, %v2723_v17  ;;  %v1897_v34 = vpop.f32.mrb[5].mxu0 }
 0x70f   : > { %v1388_v35 = vrot.slane %v1374_v49, %v2723_v17  ;;  %v1389_v51 = vcombine.high %v1381_v50, %v1381_v50  ;;  %v1403_v52 = vadd.f32 %v1775_v48, %v1381_v50 }
 0x711   : > { %v1390_v53 = vcombine.high %v1388_v35, %v1388_v35  ;;  %v1404_v54 = vadd.f32 %v1775_v48, %v1389_v51  ;;  %v1405_v55 = vadd.f32 %v1775_v48, %v1388_v35  ;;  %1776 = vst.msk [vmem:[%s2740_s27 + $0x2] sm:$0x3] %vm547_vm2, %v1403_v52 }
 0x713   : > { %v1406_v17 = vadd.f32 %v1775_v48, %v1390_v53  ;;  %1777 = vst.msk [vmem:[%s2740_s27 + $0x8] sm:$0x3] %vm547_vm2, %v1404_v54  ;;  %1778 = vst.msk [vmem:[%s2740_s27 + $0xe] sm:$0x3] %vm547_vm2, %v1405_v55 }
 0x715   : > { %1779 = vst.msk [vmem:[%s2740_s27 + $0x14] sm:$0x3] %vm547_vm2, %v1406_v17 }
 0x716   : > { %2281 = shalt.err (!%p2278_p6)
}
 0x717   : > { %s2282_s27 = scalar_lea.hbm %s2899_s18, 384  ;;  %s2286_s16 = scalar_lea.hbm %s2990_s28, 768 }
 0x718   : > { %p2283_p11 = scmp.ne.s32.totalorder %s2899_s18, %s2282_s27  ;;  %p2287_p7 = scmp.lt.u32.totalorder %s2899_s18, %s2990_s28 }
 0x719   : > { %p2288_p12 = scmp.lt.u32.totalorder %s2286_s16, %s2282_s27  ;;  %p2290_p2 = scmp.lt.u32.totalorder %s2282_s27, %s2899_s18 }
 0x71a   : > { %p2284_p10 = pnand %p2283_p11, %p2625_p5 }
 0x71b   : > { %p2289_p1 = por %p2288_p12, %p2287_p7 }
 0x71c   : > { %p2285_p3 = pneg %p2284_p10 }
 0x71d   : > { %p2291_p13 = por %p2290_p2, %p2289_p1 }
 0x71f   : > { %p2292_p9 = pnand %p2291_p13, %p2285_p3 }
 0x721   : > { %2295 = shalt.err (!%p2292_p9)
}
 0x722   : > { %s2377_s25 = smov 32   ;;  %s2378_s26 = smov 2  }
 0x723   : > { %1991 = dma.vmem_to_hbm [thread:$0]  (%p2625_p5), %s2901_s29, 384, %s2899_s18, %s1602_s13, %s2377_s25, %s2377_s25, %s2378_s26  }
 0x724 PF: > { %s2991_s23 = sld [smem:[#allocation22_spill]]  ;;  %s2992_s24 = sld [smem:[#allocation23_spill]] }
 0x725   : > { %p2994_p4 = scmp.ge.s32.totalorder %s2354_s12, 2 }
 0x72a   : > { %s1631_s14 = sand.u32 1, %s2991_s23   ;;  %p2993_p0 = scmp.ne.s32.totalorder %s2992_s24, 0 }
 0x72b   : > { %s1632_s22 = scalar_lea.sflag [#allocation7], %s1631_s14 }
 0x72c   : > { %p2014_p8 = pnand %p2994_p4, %p2993_p0 }
 0x72e   : > { %2337 = dma.done.wait (!%p2014_p8), %s1632_s22, 384  }
 0x72f   : > { %2339 = vsyncadd (!%p2014_p8), %s1632_s22, 4294966912  ;;  %p22_p6 = scmp.ge.s32.totalorder %s2611_s20, 4   ;;  %s2995_s30 = smov %s2346_s10 }
 0x730   : > { %s2996_s10 = smov %s2350_s11  ;;  %s2997_s11 = smov %s2621_s9 }
 0x731   : > { %s2998_s12 = smov %s2611_s20  ;;  %24 = sbr.rel (!%p22_p6) target bundleno = 9 (0x9), region = 149 }
 0x738   :  { %1637 = vsyncpa [#allocation6], 1 }
 0x739   :  { %1639 = vsyncpa [#allocation6 + $0x1], 1 }
 0x73a   :  { %1640 = vsyncpa [#allocation9], 1 }
 0x73b   :  { %1641 = vsyncpa [#allocation13], 1 }
 0x73c   :  { %1642 = vsyncpa [#allocation7], 1 }
 0x73d   :  { %1644 = vsyncpa [#allocation7 + $0x1], 1 }

</bundles_post_ra>
